<compile_context>
chip_gen: v5e
topology: v5e:2x2
jax: 0.10.0
libtpu: 0.0.40
codegen_flags: <defaults>
</compile_context>

<pallas_src>
import functools

import jax
import jax.numpy as jnp
from jax.experimental import pallas as pl
from jax.experimental.pallas import tpu as pltpu


_LANE = 128                           # lane width: pad feature dims to this
_VMEM_LIMIT = 48 * 1024 * 1024        # safe on v5e/v6e (128 MiB) and v7x (64 MiB/TC)
_XW_RESIDENT_BYTES = 8 * 1024 * 1024  # keep XW fully VMEM-resident up to this size


def _round_up(x, m):
    return ((x + m - 1) // m) * m


def _pad2d(x, rows, cols, dtype):
    out = jnp.zeros((rows, cols), dtype)
    return out.at[: x.shape[0], : x.shape[1]].set(x.astype(dtype))


# --------------------------------------------------------------------------- #
# Aggregation kernels:  acc = (A+I)_tile @ XW   (f32 accumulator, reduction on
# grid axis 1), epilogue applies D^-1/2 row scale + bias (+ relu + fused W2).
# --------------------------------------------------------------------------- #
def _accumulate(a_ref, xw_ref, acc_ref, *, tk, xw_resident):
    k = pl.program_id(1)

    @pl.when(k == 0)
    def _():
        acc_ref[...] = jnp.zeros_like(acc_ref)

    if xw_resident:
        # XW lives fully in VMEM (constant block index) -> slice the k-th chunk.
        start = pl.multiple_of(k * tk, tk)
        xw_blk = xw_ref[pl.ds(start, tk), :]
    else:
        xw_blk = xw_ref[...]

    acc_ref[...] += jnp.dot(a_ref[...], xw_blk, preferred_element_type=jnp.float32)


def _agg_plain_kernel(a_ref, xw_ref, b_ref, d_ref, o_ref, acc_ref,
                      *, tk, xw_resident):
    _accumulate(a_ref, xw_ref, acc_ref, tk=tk, xw_resident=xw_resident)

    @pl.when(pl.program_id(1) == pl.num_programs(1) - 1)
    def _():
        d = d_ref[...]                               # (tm, 1) f32, 0 on pad rows
        out = d * acc_ref[...] + b_ref[...]          # D^-1/2 row scale + bias (f32)
        out = jnp.where(d > 0.0, out, 0.0)           # mask padded rows
        o_ref[...] = out.astype(o_ref.dtype)


def _agg_fused_kernel(a_ref, xw_ref, b_ref, d_ref, w2_ref, o_ref, acc_ref,
                      *, tk, xw_resident):
    _accumulate(a_ref, xw_ref, acc_ref, tk=tk, xw_resident=xw_resident)

    @pl.when(pl.program_id(1) == pl.num_programs(1) - 1)
    def _():
        d = d_ref[...]                                             # (tm, 1) f32
        h = jnp.maximum(d * acc_ref[...] + b_ref[...], 0.0)        # layer-1 relu
        xw2 = jnp.dot(h.astype(w2_ref.dtype), w2_ref[...],         # fused H @ [Wmu|Wls]
                      preferred_element_type=jnp.float32)
        o_ref[...] = (d * xw2).astype(o_ref.dtype)                 # pre-scale for pass 2
                                                                   # (d=0 zeroes pad rows)


def agg_pass(a_plus_i, xw, bias, d_inv_sqrt, *, tm, tk, out_dtype, w2=None):
    """out = D^-1/2 (A+I) xw + bias   (pass 2),   or, with w2 given (pass 1):
       out = D^-1/2 * relu(D^-1/2 (A+I) xw + bias) @ w2."""
    n_pad = a_plus_i.shape[0]
    acc_width = xw.shape[1]
    out_width = w2.shape[1] if w2 is not None else acc_width

    xw_resident = n_pad * acc_width * xw.dtype.itemsize <= _XW_RESIDENT_BYTES
    if xw_resident:
        xw_spec = pl.BlockSpec((n_pad, acc_width), lambda i, k: (0, 0))
    else:
        xw_spec = pl.BlockSpec((tk, acc_width), lambda i, k: (k, 0))

    in_specs = [
        pl.BlockSpec((tm, tk), lambda i, k: (i, k)),        # A+I tile (bf16, exact 0/1)
        xw_spec,                                            # XW (pre-scaled by D^-1/2)
        pl.BlockSpec((1, acc_width), lambda i, k: (0, 0)),  # bias (f32)
        pl.BlockSpec((tm, 1), lambda i, k: (i, 0)),         # D^-1/2 rows (f32)
    ]
    operands = [a_plus_i, xw, bias, d_inv_sqrt]
    if w2 is not None:
        in_specs.append(pl.BlockSpec(w2.shape, lambda i, k: (0, 0)))   # small, resident
        operands.append(w2)
        kernel = functools.partial(_agg_fused_kernel, tk=tk, xw_resident=xw_resident)
    else:
        kernel = functools.partial(_agg_plain_kernel, tk=tk, xw_resident=xw_resident)

    flops = 2 * n_pad * n_pad * acc_width
    if w2 is not None:
        flops += 2 * n_pad * w2.shape[0] * w2.shape[1]
    xw_reads = 1 if xw_resident else (n_pad // tm)
    bytes_accessed = (n_pad * n_pad * a_plus_i.dtype.itemsize
                      + n_pad * acc_width * xw.dtype.itemsize * xw_reads
                      + n_pad * out_width * jnp.dtype(out_dtype).itemsize)

    return pl.pallas_call(
        kernel,
        out_shape=jax.ShapeDtypeStruct((n_pad, out_width), out_dtype),
        grid_spec=pltpu.PrefetchScalarGridSpec(
            num_scalar_prefetch=0,
            grid=(n_pad // tm, n_pad // tk),
            in_specs=in_specs,
            out_specs=pl.BlockSpec((tm, out_width), lambda i, k: (i, 0)),
            scratch_shapes=[pltpu.VMEM((tm, acc_width), jnp.float32)],
        ),
        compiler_params=pltpu.CompilerParams(
            dimension_semantics=("parallel", "arbitrary"),
            vmem_limit_bytes=_VMEM_LIMIT,
        ),
        cost_estimate=pl.CostEstimate(flops=flops, transcendentals=0,
                                      bytes_accessed=bytes_accessed),
    )(*operands)


# --------------------------------------------------------------------------- #
# Graph setup: unnormalized A+I (exact 0/1 entries) built directly at padded
# size / target dtype, plus the f32 D^-1/2 row-scale vector (0 on pad rows).
# TODO(synk): for large sparse graphs replace this dense O(N^2) A+I with a
#             gather/segment-sum aggregation via PrefetchScalarGridSpec.
# --------------------------------------------------------------------------- #
def build_adjacency(edge_index, num_nodes, n_pad, dtype=jnp.bfloat16):
    row, col = edge_index[0], edge_index[1]           # row = source j, col = target i
    loop = jnp.arange(num_nodes, dtype=edge_index.dtype)
    rows = jnp.concatenate([row, loop])
    cols = jnp.concatenate([col, loop])
    ones = jnp.ones(rows.shape[0], jnp.float32)
    deg = jnp.zeros((n_pad,), jnp.float32).at[cols].add(ones)
    d_inv_sqrt = jnp.where(deg > 0.0, jax.lax.rsqrt(jnp.maximum(deg, 1e-12)), 0.0)
    a_plus_i = jnp.zeros((n_pad, n_pad), dtype).at[cols, rows].add(ones.astype(dtype))
    return a_plus_i, d_inv_sqrt.reshape(n_pad, 1)


# --------------------------------------------------------------------------- #
# Encoder forward: (mu, logstd)
# --------------------------------------------------------------------------- #
def gcn_encoder(x, edge_index, params):
    n, _ = x.shape
    hidden = params["w1"].shape[1]
    out_c = params["w_mu"].shape[1]

    # Tile plan: lane-dense, (8,128)-aligned, multi-MiB A tiles (HBM-bound kernel).
    n_pad = _round_up(n, 256)
    tm = 512 if n_pad % 512 == 0 else 256
    tk = next(t for t in (2048, 1024, 512, 256) if n_pad % t == 0)
    hid_pad = _round_up(hidden, _LANE)
    out2_pad = _round_up(2 * out_c, _LANE)

    # A+I kept unnormalized (exact in bf16); normalization applied as f32 scales.
    # TODO(synk): on v7x store A+I as float8_e4m3 (still exact 0/1) to halve HBM bytes.
    a_plus_i, d = build_adjacency(edge_index, n, n_pad, dtype=jnp.bfloat16)

    # Layer-1 feature transform is tiny (n x f_in x hidden): plain XLA matmul,
    # with the source-side D^-1/2 scaling folded in, then padded to bf16.
    xw1 = (x.astype(jnp.float32) @ params["w1"].astype(jnp.float32)) * d[:n]
    xw1_p = _pad2d(xw1, n_pad, hid_pad, jnp.bfloat16)
    b1_p = _pad2d(params["b1"].reshape(1, -1), 1, hid_pad, jnp.float32)

    # mu / logstd weights fused into one lane-dense pass: W2 = [Wmu | Wls].
    w2 = jnp.concatenate([params["w_mu"], params["w_ls"]], axis=1)
    b2 = jnp.concatenate([params["b_mu"], params["b_ls"]], axis=0)
    w2_p = _pad2d(w2, hid_pad, out2_pad, jnp.bfloat16)
    b2_p = _pad2d(b2.reshape(1, -1), 1, out2_pad, jnp.float32)

    # Pass 1 (fused): xw2 = D^-1/2 * relu(D^-1/2 (A+I) xw1 + b1) @ [Wmu|Wls]
    #   (h is never written to HBM; W2 rides on MXU slack in the epilogue.)
    xw2 = agg_pass(a_plus_i, xw1_p, b1_p, d, tm=tm, tk=tk,
                   out_dtype=jnp.bfloat16, w2=w2_p)

    # Pass 2: [mu | logstd] = D^-1/2 (A+I) xw2 + [bmu | bls]
    muls = agg_pass(a_plus_i, xw2, b2_p, d, tm=tm, tk=tk,
                    out_dtype=jnp.float32, w2=None)

    mu = muls[:n, :out_c]
    logstd = muls[:n, out_c:2 * out_c]
    return mu, logstd


def _glorot(key, shape):
    fan_in, fan_out = shape
    limit = (6.0 / (fan_in + fan_out)) ** 0.5
    return jax.random.uniform(key, shape, jnp.float32, -limit, limit)


if __name__ == "__main__":
    key = jax.random.PRNGKey(0)
    k_x, k_w1, k_wmu, k_wls = jax.random.split(key, 4)

    num_nodes = 16
    in_channels = 8
    out_channels = 4
    hidden = 2 * out_channels

    # Node features
    x = jax.random.normal(k_x, (num_nodes, in_channels), dtype=jnp.float32)

    # Deterministic small graph: ring + a few chords, made undirected.
    src = jnp.array(list(range(num_nodes)) + [0, 3, 5, 7, 9, 11], dtype=jnp.int32)
    dst = jnp.array([(i + 1) % num_nodes for i in range(num_nodes)]
                    + [8, 12, 1, 14, 2, 6], dtype=jnp.int32)
    edge_index = jnp.stack([jnp.concatenate([src, dst]),
                            jnp.concatenate([dst, src])])  # [2, 44]

    # Deterministic parameter init (GCNConv: glorot weight, zero bias).
    params = {
        "w1": _glorot(k_w1, (in_channels, hidden)),
        "b1": jnp.zeros((hidden,), jnp.float32),
        "w_mu": _glorot(k_wmu, (hidden, out_channels)),
        "b_mu": jnp.zeros((out_channels,), jnp.float32),
        "w_ls": _glorot(k_wls, (hidden, out_channels)),
        "b_ls": jnp.zeros((out_channels,), jnp.float32),
    }

    encoder = jax.jit(gcn_encoder)
    mu, logstd = encoder(x, edge_index, params)
    jax.block_until_ready((mu, logstd))

    assert mu.shape == (num_nodes, out_channels)
    assert logstd.shape == (num_nodes, out_channels)

    # Pure-JAX f32 reference (normalization is exact now; remaining error is bf16
    # rounding of the XW operands only).
    row, col = edge_index[0], edge_index[1]
    loop = jnp.arange(num_nodes, dtype=jnp.int32)
    rows = jnp.concatenate([row, loop])
    cols = jnp.concatenate([col, loop])
    ones = jnp.ones(rows.shape[0], jnp.float32)
    deg = jnp.zeros((num_nodes,), jnp.float32).at[cols].add(ones)
    dis = jnp.where(deg > 0, jax.lax.rsqrt(deg), 0.0)
    a_ref = jnp.zeros((num_nodes, num_nodes), jnp.float32).at[cols, rows].add(
        dis[cols] * dis[rows])
    h_ref = jnp.maximum(a_ref @ (x @ params["w1"]) + params["b1"], 0.0)
    mu_ref = a_ref @ (h_ref @ params["w_mu"]) + params["b_mu"]
    ls_ref = a_ref @ (h_ref @ params["w_ls"]) + params["b_ls"]

    assert jnp.allclose(mu, mu_ref, atol=5e-2, rtol=5e-2)
    assert jnp.allclose(logstd, ls_ref, atol=5e-2, rtol=5e-2)
    assert bool(jnp.all(jnp.isfinite(mu))) and bool(jnp.all(jnp.isfinite(logstd)))

    print("KERNEL_OK")
</pallas_src>

<mosaic_0001>
module attributes {stable_mosaic.version = 11 : i64} {
  func.func @_agg_fused_kernel(%arg0: i32, %arg1: i32, %arg2: memref<256x256xbf16, #tpu.memory_space<vmem>>, %arg3: memref<256x128xbf16, #tpu.memory_space<vmem>>, %arg4: memref<1x128xf32, #tpu.memory_space<vmem>>, %arg5: memref<256x1xf32, #tpu.memory_space<vmem>>, %arg6: memref<128x128xbf16, #tpu.memory_space<vmem>>, %arg7: memref<256x128xbf16, #tpu.memory_space<vmem>>, %arg8: memref<256x128xf32, #tpu.memory_space<vmem>>) attributes {dimension_semantics = [#tpu.dimension_semantics<parallel>, #tpu.dimension_semantics<arbitrary>], iteration_bounds = array<i64: 1, 1>, scalar_prefetch = 0 : i64, scratch_operands = 1 : i64, tpu.core_type = #tpu.core_type<tc>, window_params = [{transform_indices = @transform_0, window_bounds = array<i64: 256, 256>}, {pipeline_mode = #tpu.pipeline_mode<synchronous>, transform_indices = @transform_1, window_bounds = array<i64: 256, 128>}, {pipeline_mode = #tpu.pipeline_mode<synchronous>, transform_indices = @transform_2, window_bounds = array<i64: 1, 128>}, {transform_indices = @transform_3, window_bounds = array<i64: 256, 1>}, {pipeline_mode = #tpu.pipeline_mode<synchronous>, transform_indices = @transform_4, window_bounds = array<i64: 128, 128>}, {transform_indices = @transform_5, window_bounds = array<i64: 256, 128>}]} {
    %c0_i32 = arith.constant 0 : i32
    %0 = arith.cmpi eq, %arg1, %c0_i32 : i32
    %1 = arith.extui %0 : i1 to i32
    %c0_i32_0 = arith.constant 0 : i32
    %2 = arith.cmpi ne, %1, %c0_i32_0 : i32
    scf.if %2 {
      %cst_9 = arith.constant 0.000000e+00 : f32
      %15 = vector.broadcast %cst_9 : f32 to vector<256x128xf32>
      %c0_10 = arith.constant 0 : index
      %c0_11 = arith.constant 0 : index
      %16 = vector.load %arg8[%c0_10, %c0_11] : memref<256x128xf32, #tpu.memory_space<vmem>>, vector<256x128xf32>
      tpu.vector_store %arg8[%c0_10, %c0_11], %15 {strides = array<i32>} : memref<256x128xf32, #tpu.memory_space<vmem>>, vector<256x128xf32>,
    } else {
    }
    %c256_i32 = arith.constant 256 : i32
    %3 = arith.muli %arg1, %c256_i32 : i32
    %4 = tpu.assume_multiple %3, 256 : i32
    %5 = arith.index_cast %4 : i32 to index
    %c0 = arith.constant 0 : index
    %6 = vector.load %arg3[%5, %c0] : memref<256x128xbf16, #tpu.memory_space<vmem>>, vector<256x128xbf16>
    %c0_1 = arith.constant 0 : index
    %c0_2 = arith.constant 0 : index
    %7 = vector.load %arg8[%c0_1, %c0_2] : memref<256x128xf32, #tpu.memory_space<vmem>>, vector<256x128xf32>
    %c0_3 = arith.constant 0 : index
    %c0_4 = arith.constant 0 : index
    %8 = vector.load %arg2[%c0_3, %c0_4] : memref<256x256xbf16, #tpu.memory_space<vmem>>, vector<256x256xbf16>
    %cst = arith.constant dense<0.000000e+00> : vector<256x128xf32>
    %9 = tpu.matmul %8, %6, %cst {dimension_numbers = #tpu.dot_dimension_numbers<[1], [0], [0], [1], [0, 0, 1, 1], [], []>} : vector<256x256xbf16>, vector<256x128xbf16>, vector<256x128xf32> -> vector<256x128xf32>
    %10 = arith.addf %7, %9 : vector<256x128xf32>
    %c0_5 = arith.constant 0 : index
    %c0_6 = arith.constant 0 : index
    %11 = vector.load %arg8[%c0_5, %c0_6] : memref<256x128xf32, #tpu.memory_space<vmem>>, vector<256x128xf32>
    tpu.vector_store %arg8[%c0_5, %c0_6], %10 {strides = array<i32>} : memref<256x128xf32, #tpu.memory_space<vmem>>, vector<256x128xf32>,
    %c0_i32_7 = arith.constant 0 : i32
    %12 = arith.cmpi eq, %arg1, %c0_i32_7 : i32
    %13 = arith.extui %12 : i1 to i32
    %c0_i32_8 = arith.constant 0 : i32
    %14 = arith.cmpi ne, %13, %c0_i32_8 : i32
    scf.if %14 {
      %c0_9 = arith.constant 0 : index
      %c0_10 = arith.constant 0 : index
      %15 = vector.load %arg5[%c0_9, %c0_10] : memref<256x1xf32, #tpu.memory_space<vmem>>, vector<256x1xf32>
      %c0_11 = arith.constant 0 : index
      %c0_12 = arith.constant 0 : index
      %16 = vector.load %arg8[%c0_11, %c0_12] : memref<256x128xf32, #tpu.memory_space<vmem>>, vector<256x128xf32>
      %17 = vector.broadcast %15 : vector<256x1xf32> to vector<256x128xf32>
      %18 = arith.mulf %17, %16 : vector<256x128xf32>
      %c0_13 = arith.constant 0 : index
      %c0_14 = arith.constant 0 : index
      %19 = vector.load %arg4[%c0_13, %c0_14] : memref<1x128xf32, #tpu.memory_space<vmem>>, vector<1x128xf32>
      %20 = vector.broadcast %19 : vector<1x128xf32> to vector<256x128xf32>
      %21 = arith.addf %18, %20 : vector<256x128xf32>
      %cst_15 = arith.constant 0.000000e+00 : f32
      %22 = vector.broadcast %cst_15 : f32 to vector<256x128xf32>
      %23 = arith.maximumf %21, %22 : vector<256x128xf32>
      %24 = arith.truncf %23 : vector<256x128xf32> to vector<256x128xbf16>
      %c0_16 = arith.constant 0 : index
      %c0_17 = arith.constant 0 : index
      %25 = vector.load %arg6[%c0_16, %c0_17] : memref<128x128xbf16, #tpu.memory_space<vmem>>, vector<128x128xbf16>
      %cst_18 = arith.constant dense<0.000000e+00> : vector<256x128xf32>
      %26 = tpu.matmul %24, %25, %cst_18 {dimension_numbers = #tpu.dot_dimension_numbers<[1], [0], [0], [1], [0, 0, 1, 1], [], []>} : vector<256x128xbf16>, vector<128x128xbf16>, vector<256x128xf32> -> vector<256x128xf32>
      %27 = vector.broadcast %15 : vector<256x1xf32> to vector<256x128xf32>
      %28 = arith.mulf %27, %26 : vector<256x128xf32>
      %29 = arith.truncf %28 : vector<256x128xf32> to vector<256x128xbf16>
      %c0_19 = arith.constant 0 : index
      %c0_20 = arith.constant 0 : index
      %30 = vector.load %arg7[%c0_19, %c0_20] : memref<256x128xbf16, #tpu.memory_space<vmem>>, vector<256x128xbf16>
      tpu.vector_store %arg7[%c0_19, %c0_20], %29 {strides = array<i32>} : memref<256x128xbf16, #tpu.memory_space<vmem>>, vector<256x128xbf16>,
    } else {
    }
    return
  }
  func.func @transform_0(%arg0: i32, %arg1: i32) -> (i32, i32) {
    %c0_i32 = arith.constant 0 : i32
    return %arg0, %arg1 : i32, i32
  }
  func.func @transform_1(%arg0: i32, %arg1: i32) -> (i32, i32) {
    %c0_i32 = arith.constant 0 : i32
    %c0_i32_0 = arith.constant 0 : i32
    %c0_i32_1 = arith.constant 0 : i32
    return %c0_i32, %c0_i32_0 : i32, i32
  }
  func.func @transform_2(%arg0: i32, %arg1: i32) -> (i32, i32) {
    %c0_i32 = arith.constant 0 : i32
    %c0_i32_0 = arith.constant 0 : i32
    %c0_i32_1 = arith.constant 0 : i32
    return %c0_i32, %c0_i32_0 : i32, i32
  }
  func.func @transform_3(%arg0: i32, %arg1: i32) -> (i32, i32) {
    %c0_i32 = arith.constant 0 : i32
    %c0_i32_0 = arith.constant 0 : i32
    return %arg0, %c0_i32 : i32, i32
  }
  func.func @transform_4(%arg0: i32, %arg1: i32) -> (i32, i32) {
    %c0_i32 = arith.constant 0 : i32
    %c0_i32_0 = arith.constant 0 : i32
    %c0_i32_1 = arith.constant 0 : i32
    return %c0_i32, %c0_i32_0 : i32, i32
  }
  func.func @transform_5(%arg0: i32, %arg1: i32) -> (i32, i32) {
    %c0_i32 = arith.constant 0 : i32
    %c0_i32_0 = arith.constant 0 : i32
    return %arg0, %c0_i32 : i32, i32
  }
}

module attributes {stable_mosaic.version = 11 : i64} {
  func.func @_agg_plain_kernel(%arg0: i32, %arg1: i32, %arg2: memref<256x256xbf16, #tpu.memory_space<vmem>>, %arg3: memref<256x128xbf16, #tpu.memory_space<vmem>>, %arg4: memref<1x128xf32, #tpu.memory_space<vmem>>, %arg5: memref<256x1xf32, #tpu.memory_space<vmem>>, %arg6: memref<256x128xf32, #tpu.memory_space<vmem>>, %arg7: memref<256x128xf32, #tpu.memory_space<vmem>>) attributes {dimension_semantics = [#tpu.dimension_semantics<parallel>, #tpu.dimension_semantics<arbitrary>], iteration_bounds = array<i64: 1, 1>, scalar_prefetch = 0 : i64, scratch_operands = 1 : i64, tpu.core_type = #tpu.core_type<tc>, window_params = [{transform_indices = @transform_0, window_bounds = array<i64: 256, 256>}, {pipeline_mode = #tpu.pipeline_mode<synchronous>, transform_indices = @transform_1, window_bounds = array<i64: 256, 128>}, {pipeline_mode = #tpu.pipeline_mode<synchronous>, transform_indices = @transform_2, window_bounds = array<i64: 1, 128>}, {transform_indices = @transform_3, window_bounds = array<i64: 256, 1>}, {transform_indices = @transform_4, window_bounds = array<i64: 256, 128>}]} {
    %c0_i32 = arith.constant 0 : i32
    %0 = arith.cmpi eq, %arg1, %c0_i32 : i32
    %1 = arith.extui %0 : i1 to i32
    %c0_i32_0 = arith.constant 0 : i32
    %2 = arith.cmpi ne, %1, %c0_i32_0 : i32
    scf.if %2 {
      %cst_9 = arith.constant 0.000000e+00 : f32
      %15 = vector.broadcast %cst_9 : f32 to vector<256x128xf32>
      %c0_10 = arith.constant 0 : index
      %c0_11 = arith.constant 0 : index
      %16 = vector.load %arg7[%c0_10, %c0_11] : memref<256x128xf32, #tpu.memory_space<vmem>>, vector<256x128xf32>
      tpu.vector_store %arg7[%c0_10, %c0_11], %15 {strides = array<i32>} : memref<256x128xf32, #tpu.memory_space<vmem>>, vector<256x128xf32>,
    } else {
    }
    %c256_i32 = arith.constant 256 : i32
    %3 = arith.muli %arg1, %c256_i32 : i32
    %4 = tpu.assume_multiple %3, 256 : i32
    %5 = arith.index_cast %4 : i32 to index
    %c0 = arith.constant 0 : index
    %6 = vector.load %arg3[%5, %c0] : memref<256x128xbf16, #tpu.memory_space<vmem>>, vector<256x128xbf16>
    %c0_1 = arith.constant 0 : index
    %c0_2 = arith.constant 0 : index
    %7 = vector.load %arg7[%c0_1, %c0_2] : memref<256x128xf32, #tpu.memory_space<vmem>>, vector<256x128xf32>
    %c0_3 = arith.constant 0 : index
    %c0_4 = arith.constant 0 : index
    %8 = vector.load %arg2[%c0_3, %c0_4] : memref<256x256xbf16, #tpu.memory_space<vmem>>, vector<256x256xbf16>
    %cst = arith.constant dense<0.000000e+00> : vector<256x128xf32>
    %9 = tpu.matmul %8, %6, %cst {dimension_numbers = #tpu.dot_dimension_numbers<[1], [0], [0], [1], [0, 0, 1, 1], [], []>} : vector<256x256xbf16>, vector<256x128xbf16>, vector<256x128xf32> -> vector<256x128xf32>
    %10 = arith.addf %7, %9 : vector<256x128xf32>
    %c0_5 = arith.constant 0 : index
    %c0_6 = arith.constant 0 : index
    %11 = vector.load %arg7[%c0_5, %c0_6] : memref<256x128xf32, #tpu.memory_space<vmem>>, vector<256x128xf32>
    tpu.vector_store %arg7[%c0_5, %c0_6], %10 {strides = array<i32>} : memref<256x128xf32, #tpu.memory_space<vmem>>, vector<256x128xf32>,
    %c0_i32_7 = arith.constant 0 : i32
    %12 = arith.cmpi eq, %arg1, %c0_i32_7 : i32
    %13 = arith.extui %12 : i1 to i32
    %c0_i32_8 = arith.constant 0 : i32
    %14 = arith.cmpi ne, %13, %c0_i32_8 : i32
    scf.if %14 {
      %c0_9 = arith.constant 0 : index
      %c0_10 = arith.constant 0 : index
      %15 = vector.load %arg5[%c0_9, %c0_10] : memref<256x1xf32, #tpu.memory_space<vmem>>, vector<256x1xf32>
      %c0_11 = arith.constant 0 : index
      %c0_12 = arith.constant 0 : index
      %16 = vector.load %arg7[%c0_11, %c0_12] : memref<256x128xf32, #tpu.memory_space<vmem>>, vector<256x128xf32>
      %17 = vector.broadcast %15 : vector<256x1xf32> to vector<256x128xf32>
      %18 = arith.mulf %17, %16 : vector<256x128xf32>
      %c0_13 = arith.constant 0 : index
      %c0_14 = arith.constant 0 : index
      %19 = vector.load %arg4[%c0_13, %c0_14] : memref<1x128xf32, #tpu.memory_space<vmem>>, vector<1x128xf32>
      %20 = vector.broadcast %19 : vector<1x128xf32> to vector<256x128xf32>
      %21 = arith.addf %18, %20 : vector<256x128xf32>
      %cst_15 = arith.constant 0.000000e+00 : f32
      %22 = vector.broadcast %cst_15 : f32 to vector<256x1xf32>
      %23 = arith.cmpf ogt, %15, %22 : vector<256x1xf32>
      %cst_16 = arith.constant 0.000000e+00 : f32
      %24 = vector.shape_cast %23 : vector<256x1xi1> to vector<256x1xi1>
      %25 = vector.broadcast %24 : vector<256x1xi1> to vector<256x128xi1>
      %26 = vector.broadcast %cst_16 : f32 to vector<256x128xf32>
      %27 = arith.select %25, %21, %26 : vector<256x128xi1>, vector<256x128xf32>
      %c0_17 = arith.constant 0 : index
      %c0_18 = arith.constant 0 : index
      %28 = vector.load %arg6[%c0_17, %c0_18] : memref<256x128xf32, #tpu.memory_space<vmem>>, vector<256x128xf32>
      tpu.vector_store %arg6[%c0_17, %c0_18], %27 {strides = array<i32>} : memref<256x128xf32, #tpu.memory_space<vmem>>, vector<256x128xf32>,
    } else {
    }
    return
  }
  func.func @transform_0(%arg0: i32, %arg1: i32) -> (i32, i32) {
    %c0_i32 = arith.constant 0 : i32
    return %arg0, %arg1 : i32, i32
  }
  func.func @transform_1(%arg0: i32, %arg1: i32) -> (i32, i32) {
    %c0_i32 = arith.constant 0 : i32
    %c0_i32_0 = arith.constant 0 : i32
    %c0_i32_1 = arith.constant 0 : i32
    return %c0_i32, %c0_i32_0 : i32, i32
  }
  func.func @transform_2(%arg0: i32, %arg1: i32) -> (i32, i32) {
    %c0_i32 = arith.constant 0 : i32
    %c0_i32_0 = arith.constant 0 : i32
    %c0_i32_1 = arith.constant 0 : i32
    return %c0_i32, %c0_i32_0 : i32, i32
  }
  func.func @transform_3(%arg0: i32, %arg1: i32) -> (i32, i32) {
    %c0_i32 = arith.constant 0 : i32
    %c0_i32_0 = arith.constant 0 : i32
    return %arg0, %c0_i32 : i32, i32
  }
  func.func @transform_4(%arg0: i32, %arg1: i32) -> (i32, i32) {
    %c0_i32 = arith.constant 0 : i32
    %c0_i32_0 = arith.constant 0 : i32
    return %arg0, %c0_i32 : i32, i32
  }
}

</mosaic_0001>

<bundles_post_ra>
// kernel: gcn_encoder.2
= control target key start
LH: loop header
LB: loop body
LE: loop exit
PB: predicated region body
PF: predicated region fallthrough
CT: control target
= control target key end

     0   :  { %v1657_v0 = vmov 0   ;;  %s2317_s3 = inlined_call_operand.vmem [shape: f32[256,1], index: 3, kind: input, shape index: {}]   ;;  %s2318_s1 = inlined_call_operand.vmem [shape: bf16[256,128], index: 1, kind: input, shape index: {}]   ;;  %s2319_s0 = inlined_call_operand.vmem [shape: bf16[256,256], index: 0, kind: input, shape index: {}]   ;;  %s2320_s2 = inlined_call_operand.vmem [shape: f32[1,128], index: 2, kind: input, shape index: {}]   ;;  %s2321_s4 = inlined_call_operand.vmem [shape: bf16[128,128], index: 4, kind: input, shape index: {}]   ;;  %s2322_s5 = inlined_call_operand.vmem [shape: bf16[256,128], index: 5, kind: output, shape index: {}]  }
   0x1   :  { %1654 = vset.pattern.permute.xlu1 %v1657_v0  ;;  %1653 = vset.pattern.permute.xlu0 %v1657_v0  ;;  %v660_v1 = vld [vmem:[%s2317_s3 + $0x10] sm:$0xff]  ;;  %v658_v2 = vld [vmem:[%s2317_s3] sm:$0xff]  ;;  %v1484_v3 = vld [vmem:[%s2318_s1 + $0x38] sm:$0xff] }
   0x2   :  { %734 = vperm.xlu1 %1654, %v660_v1   ;;  %724 = vperm.xlu0 %1653, %v658_v2   ;;  %v1700_v4 = vld [vmem:[%s2318_s1 + $0x78] sm:$0xff]  ;;  %v1483_v5 = vld [vmem:[%s2318_s1 + $0x30] sm:$0xff]  ;;  %v659_v8 = vld [vmem:[%s2317_s3 + $0x8] sm:$0xff] }
   0x3   :  { %413 = vmatpush.bf16.msra.mxu0 %v1484_v3  ;;  %1628 = vmatpush.bf16.msra.mxu3 %v1484_v3  ;;  %v1709_v6 = vld [vmem:[%s2318_s1 + $0x70] sm:$0xff]  ;;  %v661_v7 = vld [vmem:[%s2317_s3 + $0x18] sm:$0xff]  ;;  %v1482_v9 = vld [vmem:[%s2318_s1 + $0x28] sm:$0xff] }
   0x4   :  { %502 = vmatpush.bf16.msra.mxu1 %v1700_v4  ;;  %1655 = vset.pattern.permute.xlu2 %v1657_v0  ;;  %v1724_v10 = vld [vmem:[%s2318_s1 + $0x68] sm:$0xff]  ;;  %v662_v11 = vld [vmem:[%s2317_s3 + $0x20] sm:$0xff]  ;;  %v665_v15 = vld [vmem:[%s2317_s3 + $0x38] sm:$0xff] }
   0x5   :  { %744 = vperm.xlu2 %1655, %v662_v11   ;;  %v1481_v12 = vld [vmem:[%s2318_s1 + $0x20] sm:$0xff]  ;;  %v663_v14 = vld [vmem:[%s2317_s3 + $0x28] sm:$0xff]  ;;  %v664_v16 = vld [vmem:[%s2317_s3 + $0x30] sm:$0xff] }
   0x6   :  { %v1736_v13 = vld [vmem:[%s2318_s1 + $0x60] sm:$0xff]  ;;  %v1480_v17 = vld [vmem:[%s2318_s1 + $0x18] sm:$0xff]  ;;  %v1479_v19 = vld [vmem:[%s2318_s1 + $0x10] sm:$0xff] }
   0x7   :  { %414 = vmatpush.bf16.msra.mxu0 %v1483_v5  ;;  %1629 = vmatpush.bf16.msra.mxu3 %v1483_v5  ;;  %v1754_v18 = vld [vmem:[%s2318_s1 + $0x58] sm:$0xff]  ;;  %v1763_v20 = vld [vmem:[%s2318_s1 + $0x50] sm:$0xff]  ;;  %v666_v21 = vld [vmem:[%s2317_s3 + $0x40] sm:$0xff] }
   0x8   :  { %503 = vmatpush.bf16.msra.mxu1 %v1709_v6  ;;  %v668_v22 = vld [vmem:[%s2317_s3 + $0x50] sm:$0xff]  ;;  %v667_v23 = vld [vmem:[%s2317_s3 + $0x48] sm:$0xff]  ;;  %v1477_v26 = vld [vmem:[%s2318_s1] sm:$0xff] }
   0x9   :  { %v1478_v24 = vld [vmem:[%s2318_s1 + $0x8] sm:$0xff]  ;;  %v1789_v27 = vld [vmem:[%s2318_s1 + $0x40] sm:$0xff]  ;;  %v669_v34 = vld [vmem:[%s2317_s3 + $0x58] sm:$0xff] }
   0xa   :  { %739 = vperm.xlu1 %1654, %v661_v7   ;;  %729 = vperm.xlu0 %1653, %v659_v8   ;;  %v1781_v25 = vld [vmem:[%s2318_s1 + $0x48] sm:$0xff]  ;;  %v1255_v28 = vld [vmem:[%s2319_s0] sm:$0xf]  ;;  %v1493_v32 = vld [vmem:[%s2319_s0 + $0x4] sm:$0xf] }
   0xb   :  { %415 = vmatpush.bf16.msra.mxu0 %v1482_v9  ;;  %1630 = vmatpush.bf16.msra.mxu3 %v1482_v9  ;;  %v1494_v29 = vld [vmem:[%s2319_s0 + $0x4] sm:$0xf0]  ;;  %v1351_v30 = vld [vmem:[%s2319_s0 + $0xc0] sm:$0xf]  ;;  %v1257_v33 = vld [vmem:[%s2319_s0 + $0x8] sm:$0xf0] }
   0xc   :  { %504 = vmatpush.bf16.msra.mxu1 %v1724_v10  ;;  %v1518_v31 = vld [vmem:[%s2319_s0 + $0xc4] sm:$0xf0]  ;;  %v670_v36 = vld [vmem:[%s2317_s3 + $0x60] sm:$0xff]  ;;  %v1256_v37 = vor.u32 %v1494_v29, %v1255_v28  ;;  %v1260_v39 = vor.u32 %v1493_v32, %v1257_v33  ;;  %v672_v40 = vld [vmem:[%s2317_s3 + $0x70] sm:$0xff] }
   0xd   :  { %749 = vperm.xlu2 %1655, %v663_v14   ;;  %v671_v35 = vld [vmem:[%s2317_s3 + $0x68] sm:$0xff]  ;;  %v1352_v38 = vor.u32 %v1518_v31, %v1351_v30  ;;  %v674_v41 = vld [vmem:[%s2317_s3 + $0x80] sm:$0xff]  ;;  %v673_v42 = vld [vmem:[%s2317_s3 + $0x78] sm:$0xff] }
   0xe   :  { %v1263_v43 = vld [vmem:[%s2319_s0 + $0x10] sm:$0xf]  ;;  %v1496_v44 = vld [vmem:[%s2319_s0 + $0x14] sm:$0xf0]  ;;  %v1495_v47 = vld [vmem:[%s2319_s0 + $0x14] sm:$0xf] }
   0xf   :  { %416 = vmatpush.bf16.msra.mxu0 %v1481_v12  ;;  %1631 = vmatpush.bf16.msra.mxu3 %v1481_v12  ;;  %v1359_v45 = vld [vmem:[%s2319_s0 + $0xd0] sm:$0xf]  ;;  %v1520_v46 = vld [vmem:[%s2319_s0 + $0xd4] sm:$0xf0]  ;;  %v1265_v48 = vld [vmem:[%s2319_s0 + $0x18] sm:$0xf0]  ;;  %v1264_v52 = vor.u32 %v1496_v44, %v1263_v43 }
  0x10   :  { %505 = vmatpush.bf16.msra.mxu1 %v1736_v13  ;;  %v675_v49 = vld [vmem:[%s2317_s3 + $0x88] sm:$0xff]  ;;  %v682_v51 = vld [vmem:[%s2317_s3 + $0xc0] sm:$0xff]  ;;  %v1360_v53 = vor.u32 %v1520_v46, %v1359_v45  ;;  %v1268_v54 = vor.u32 %v1495_v47, %v1265_v48  ;;  %v676_v55 = vld [vmem:[%s2317_s3 + $0x90] sm:$0xff] }
  0x11   :  { %v683_v50 = vld [vmem:[%s2317_s3 + $0xc8] sm:$0xff]  ;;  %v684_v56 = vld [vmem:[%s2317_s3 + $0xd0] sm:$0xff]  ;;  %v677_v57 = vld [vmem:[%s2317_s3 + $0x98] sm:$0xff] }
  0x12   :  { %759 = vperm.xlu1 %1654, %v665_v15   ;;  %754 = vperm.xlu0 %1653, %v664_v16   ;;  %v1271_v58 = vld [vmem:[%s2319_s0 + $0x20] sm:$0xf]  ;;  %v1498_v59 = vld [vmem:[%s2319_s0 + $0x24] sm:$0xf0]  ;;  %v1497_v62 = vld [vmem:[%s2319_s0 + $0x24] sm:$0xf] }
  0x13   :  { %417 = vmatpush.bf16.msra.mxu0 %v1480_v17  ;;  %1632 = vmatpush.bf16.msra.mxu3 %v1480_v17  ;;  %v1367_v60 = vld [vmem:[%s2319_s0 + $0xe0] sm:$0xf]  ;;  %v1522_v61 = vld [vmem:[%s2319_s0 + $0xe4] sm:$0xf0]  ;;  %v1273_v63 = vld [vmem:[%s2319_s0 + $0x28] sm:$0xf0]  ;;  %v1272_v3 = vor.u32 %v1498_v59, %v1271_v58 }
  0x14   :  { %506 = vmatpush.bf16.msra.mxu1 %v1754_v18  ;;  %v685_v0 = vld [vmem:[%s2317_s3 + $0xd8] sm:$0xff]  ;;  %v679_v1 = vld [vmem:[%s2317_s3 + $0xa8] sm:$0xff]  ;;  %v678_v2 = vld [vmem:[%s2317_s3 + $0xa0] sm:$0xff]  ;;  %v1276_v5 = vor.u32 %v1497_v62, %v1273_v63 }
  0x15   :  { %764 = vperm.xlu2 %1655, %v666_v21   ;;  %v680_v7 = vld [vmem:[%s2317_s3 + $0xb0] sm:$0xff]  ;;  %v687_v8 = vld [vmem:[%s2317_s3 + $0xe8] sm:$0xff]  ;;  %v1524_v12 = vld [vmem:[%s2319_s0 + $0xf4] sm:$0xf0] }
  0x16   :  { %v1279_v9 = vld [vmem:[%s2319_s0 + $0x30] sm:$0xf]  ;;  %v1281_v14 = vld [vmem:[%s2319_s0 + $0x38] sm:$0xf0]  ;;  %v1287_v21 = vld [vmem:[%s2319_s0 + $0x40] sm:$0xf] }
  0x17   :  { %418 = vmatpush.bf16.msra.mxu0 %v1479_v19  ;;  %1633 = vmatpush.bf16.msra.mxu3 %v1479_v19  ;;  %v1375_v11 = vld [vmem:[%s2319_s0 + $0xf0] sm:$0xf]  ;;  %v681_v15 = vld [vmem:[%s2317_s3 + $0xb8] sm:$0xff]  ;;  %v1519_v32 = vld [vmem:[%s2319_s0 + $0xd4] sm:$0xf] }
  0x18   :  { %507 = vmatpush.bf16.msra.mxu1 %v1763_v20  ;;  %v689_v16 = vld [vmem:[%s2317_s3 + $0xf8] sm:$0xff]  ;;  %v688_v17 = vld [vmem:[%s2317_s3 + $0xf0] sm:$0xff]  ;;  %v1376_v19 = vor.u32 %v1524_v12, %v1375_v11  ;;  %v1506_v43 = vld [vmem:[%s2319_s0 + $0x64] sm:$0xf0] }
  0x19   :  { %v1295_v30 = vld [vmem:[%s2319_s0 + $0x50] sm:$0xf]  ;;  %v1504_v31 = vld [vmem:[%s2319_s0 + $0x54] sm:$0xf0]  ;;  %v1361_v33 = vld [vmem:[%s2319_s0 + $0xd8] sm:$0xf0] }
  0x1a   :  { %774 = vperm.xlu1 %1654, %v668_v22   ;;  %769 = vperm.xlu0 %1653, %v667_v23   ;;  %v1502_v22 = vld [vmem:[%s2319_s0 + $0x44] sm:$0xf0]  ;;  %v1517_v23 = vld [vmem:[%s2319_s0 + $0xc4] sm:$0xf]  ;;  %v1369_v45 = vld [vmem:[%s2319_s0 + $0xe8] sm:$0xf0] }
  0x1b   :  { %419 = vmatpush.bf16.msra.mxu0 %v1478_v24  ;;  %1634 = vmatpush.bf16.msra.mxu3 %v1478_v24  ;;  %v1353_v24 = vld [vmem:[%s2319_s0 + $0xc8] sm:$0xf0]  ;;  %v1521_v44 = vld [vmem:[%s2319_s0 + $0xe4] sm:$0xf]  ;;  %v1377_v58 = vld [vmem:[%s2319_s0 + $0xf8] sm:$0xf0] }
  0x1c   :  { %508 = vmatpush.bf16.msra.mxu1 %v1781_v25  ;;  %v1356_v28 = vor.u32 %v1517_v23, %v1353_v24  ;;  %v1505_v46 = vld [vmem:[%s2319_s0 + $0x64] sm:$0xf]  ;;  %v1305_v47 = vld [vmem:[%s2319_s0 + $0x68] sm:$0xf0]  ;;  %v1507_v59 = vld [vmem:[%s2319_s0 + $0x74] sm:$0xf] }
  0x1d   :  { %779 = vperm.xlu2 %1655, %v669_v34   ;;  %v1503_v34 = vld [vmem:[%s2319_s0 + $0x54] sm:$0xf]  ;;  %v1525_v63 = vld [vmem:[%s2321_s4] sm:$0xff]  ;;  %v1329_v23 = vld [vmem:[%s2319_s0 + $0x98] sm:$0xf0] }
  0x1f   :  { %420 = vmatpush.bf16.msra.mxu0 %v1477_v26  ;;  %1635 = vmatpush.bf16.msra.mxu3 %v1477_v26  ;;  %v1289_v26 = vld [vmem:[%s2319_s0 + $0x48] sm:$0xf0] }
  0x20   :  { %509 = vmatpush.bf16.msra.mxu1 %v1789_v27 }
  0x22   :  { %789 = vperm.xlu1 %1654, %v671_v35   ;;  %784 = vperm.xlu0 %1653, %v670_v36   ;;  %v1297_v35 = vld [vmem:[%s2319_s0 + $0x58] sm:$0xf0]  ;;  %v1296_v36 = vor.u32 %v1504_v31, %v1295_v30 }
  0x23   :  { %1636 = vmatpush.bf16.msrb.mxu3 %v1700_v4  ;;  %421 = vmatmul.bf16.vlgmr.msra.gmra.mxu0 %v1256_v37  ;;  %v1368_v4 = vor.u32 %v1522_v61, %v1367_v60  ;;  %v1364_v37 = vor.u32 %v1519_v32, %v1361_v33  ;;  %v1313_v60 = vld [vmem:[%s2319_s0 + $0x78] sm:$0xf0] }
  0x24   :  { %481 = vmatmul.bf16.vlgmr.msra.gmra.mxu3 %v1352_v38  ;;  %510 = vmatmul.bf16.vlgmr.msra.gmra.mxu1 %v1260_v39  ;;  %v1300_v38 = vor.u32 %v1503_v34, %v1297_v35  ;;  %v1532_v39 = vld [vmem:[%s2321_s4 + $0x38] sm:$0xff] }
  0x25   :  { %794 = vperm.xlu2 %1655, %v672_v40   ;;  %1062 = vmatpush.bf16.msra.mxu2 %v1532_v39  ;;  %v1531_v40 = vld [vmem:[%s2321_s4 + $0x30] sm:$0xff] }
  0x27   :  { %1637 = vmatpush.bf16.msrb.mxu3 %v1709_v6  ;;  %v686_v6 = vld [vmem:[%s2317_s3 + $0xe0] sm:$0xff] }
  0x29   :  { %1063 = vmatpush.bf16.msra.mxu2 %v1531_v40 }
  0x2a   :  { %804 = vperm.xlu1 %1654, %v674_v41   ;;  %799 = vperm.xlu0 %1653, %v673_v42   ;;  %v1530_v41 = vld [vmem:[%s2321_s4 + $0x28] sm:$0xff]  ;;  %v1303_v42 = vld [vmem:[%s2319_s0 + $0x60] sm:$0xf] }
  0x2b   :  { %1638 = vmatpush.bf16.msrb.mxu3 %v1724_v10  ;;  %v1500_v10 = vld [vmem:[%s2319_s0 + $0x34] sm:$0xf0]  ;;  %v1304_v48 = vor.u32 %v1506_v43, %v1303_v42  ;;  %v1335_v43 = vld [vmem:[%s2319_s0 + $0xa0] sm:$0xf] }
  0x2d   :  { %809 = vperm.xlu2 %1655, %v675_v49   ;;  %1064 = vmatpush.bf16.msra.mxu2 %v1530_v41  ;;  %v1372_v49 = vor.u32 %v1521_v44, %v1369_v45  ;;  %v1514_v44 = vld [vmem:[%s2319_s0 + $0xa4] sm:$0xf0] }
  0x2f   :  { %1639 = vmatpush.bf16.msrb.mxu3 %v1736_v13  ;;  %v1499_v13 = vld [vmem:[%s2319_s0 + $0x34] sm:$0xf] }
  0x32   :  { %849 = vperm.xlu1 %1654, %v683_v50   ;;  %844 = vperm.xlu0 %1653, %v682_v51   ;;  %v1529_v50 = vld [vmem:[%s2321_s4 + $0x20] sm:$0xff]  ;;  %v1308_v51 = vor.u32 %v1505_v46, %v1305_v47  ;;  %v1337_v47 = vld [vmem:[%s2319_s0 + $0xa8] sm:$0xf0] }
  0x33   :  { %1640 = vmatpush.bf16.msrb.mxu3 %v1754_v18  ;;  %426 = vmatmul.bf16.gmra.mxu0 %v1264_v52  ;;  %v1280_v18 = vor.u32 %v1500_v10, %v1279_v9  ;;  %v1528_v52 = vld [vmem:[%s2321_s4 + $0x18] sm:$0xff]  ;;  %v1513_v46 = vld [vmem:[%s2319_s0 + $0xa4] sm:$0xf] }
  0x34   :  { %486 = vmatmul.bf16.gmra.mxu3 %v1360_v53  ;;  %515 = vmatmul.bf16.gmra.mxu1 %v1268_v54  ;;  %v1527_v53 = vld [vmem:[%s2321_s4 + $0x10] sm:$0xff] }
  0x35   :  { %814 = vperm.xlu2 %1655, %v676_v55   ;;  %1065 = vmatpush.bf16.msra.mxu2 %v1529_v50  ;;  %v1311_v54 = vld [vmem:[%s2319_s0 + $0x70] sm:$0xf]  ;;  %v1526_v55 = vld [vmem:[%s2321_s4 + $0x8] sm:$0xff] }
  0x37   :  { %1641 = vmatpush.bf16.msrb.mxu3 %v1763_v20  ;;  %v1284_v20 = vor.u32 %v1499_v13, %v1281_v14  ;;  %v2052_v14 = vld [vmem:[%s2320_s2] ss:$0 sm:$0xff] }
  0x39   :  { %1066 = vmatpush.bf16.msra.mxu2 %v1528_v52 }
  0x3a   :  { %854 = vperm.xlu1 %1654, %v684_v56   ;;  %819 = vperm.xlu0 %1653, %v677_v57   ;;  %v1508_v56 = vld [vmem:[%s2319_s0 + $0x74] sm:$0xf0]  ;;  %v1523_v57 = vld [vmem:[%s2319_s0 + $0xf4] sm:$0xf] }
  0x3b   :  { %1642 = vmatpush.bf16.msrb.mxu3 %v1781_v25  ;;  %v1501_v25 = vld [vmem:[%s2319_s0 + $0x44] sm:$0xf]  ;;  %v1312_v61 = vor.u32 %v1508_v56, %v1311_v54  ;;  %v1380_v62 = vor.u32 %v1523_v57, %v1377_v58 }
  0x3c   :  { %v1292_v29 = vor.u32 %v1501_v25, %v1289_v26 }
  0x3d   :  { %859 = vperm.xlu2 %1655, %v685_v0   ;;  %1067 = vmatpush.bf16.msra.mxu2 %v1527_v53  ;;  %v1316_v0 = vor.u32 %v1507_v59, %v1313_v60 }
  0x3f   :  { %1643 = vmatpush.bf16.msrb.mxu3 %v1789_v27  ;;  %v1288_v27 = vor.u32 %v1502_v22, %v1287_v21  ;;  %v1511_v22 = vld [vmem:[%s2319_s0 + $0x94] sm:$0xf] }
  0x41   :  { %1068 = vmatpush.bf16.msra.mxu2 %v1526_v55 }
  0x42   :  { %829 = vperm.xlu1 %1654, %v679_v1   ;;  %824 = vperm.xlu0 %1653, %v678_v2   ;;  %v1319_v1 = vld [vmem:[%s2319_s0 + $0x80] sm:$0xf]  ;;  %v1510_v2 = vld [vmem:[%s2319_s0 + $0x84] sm:$0xf0] }
  0x43   :  { %431 = vmatmul.bf16.gmra.mxu0 %v1272_v3  ;;  %1644 = vmatpush.bf16.msra.mxu3 %v1532_v39  ;;  %v1509_v3 = vld [vmem:[%s2319_s0 + $0x84] sm:$0xf] }
  0x44   :  { %491 = vmatmul.bf16.gmra.mxu3 %v1368_v4  ;;  %520 = vmatmul.bf16.gmra.mxu1 %v1276_v5  ;;  %v1321_v4 = vld [vmem:[%s2319_s0 + $0x88] sm:$0xf0]  ;;  %v1320_v5 = vor.u32 %v1510_v2, %v1319_v1 }
  0x45   :  { %864 = vperm.xlu2 %1655, %v686_v6   ;;  %1069 = vmatpush.bf16.msra.mxu2 %v1525_v63 }
  0x47   :  { %1645 = vmatpush.bf16.msra.mxu3 %v1531_v40 }
  0x4a   :  { %834 = vperm.xlu1 %1654, %v680_v7   ;;  %869 = vperm.xlu0 %1653, %v687_v8   ;;  %v1324_v7 = vor.u32 %v1509_v3, %v1321_v4  ;;  %v1343_v3 = vld [vmem:[%s2319_s0 + $0xb0] sm:$0xf]  ;;  %v1516_v4 = vld [vmem:[%s2319_s0 + $0xb4] sm:$0xf0] }
  0x4b   :  { %1646 = vmatpush.bf16.msra.mxu3 %v1530_v41 }
  0x4d   :  { %839 = vperm.xlu2 %1655, %v681_v15  }
  0x4f   :  { %1647 = vmatpush.bf16.msra.mxu3 %v1529_v50  ;;  %v1336_v50 = vor.u32 %v1514_v44, %v1335_v43 }
  0x52   :  { %879 = vperm.xlu1 %1654, %v689_v16   ;;  %874 = vperm.xlu0 %1653, %v688_v17  }
  0x53   :  { %436 = vmatmul.bf16.gmra.mxu0 %v1280_v18  ;;  %1648 = vmatpush.bf16.msra.mxu3 %v1528_v52  ;;  %v1340_v52 = vor.u32 %v1513_v46, %v1337_v47 }
  0x54   :  { %496 = vmatmul.bf16.gmra.mxu3 %v1376_v19  ;;  %525 = vmatmul.bf16.gmra.mxu1 %v1284_v20  ;;  %v1327_v19 = vld [vmem:[%s2319_s0 + $0x90] sm:$0xf]  ;;  %v1512_v20 = vld [vmem:[%s2319_s0 + $0x94] sm:$0xf0] }
  0x55   :  { %v1328_v26 = vor.u32 %v1512_v20, %v1327_v19 }
  0x57   :  { %1649 = vmatpush.bf16.msra.mxu3 %v1527_v53 }
  0x5b   :  { %1650 = vmatpush.bf16.msra.mxu3 %v1526_v55 }
  0x5f   :  { %1651 = vmatpush.bf16.msra.mxu3 %v1525_v63 }
  0x63   :  { %441 = vmatmul.bf16.gmra.mxu0 %v1288_v27 }
  0x64   :  { %570 = vmatmul.bf16.vlgmr.msrb.gmra.mxu3 %v1356_v28  ;;  %530 = vmatmul.bf16.gmra.mxu1 %v1292_v29  ;;  %v1332_v28 = vor.u32 %v1511_v22, %v1329_v23 }
  0x73   :  { %446 = vmatmul.bf16.gmra.mxu0 %v1296_v36 }
  0x74   :  { %575 = vmatmul.bf16.gmra.mxu3 %v1364_v37  ;;  %535 = vmatmul.bf16.gmra.mxu1 %v1300_v38  ;;  %v2044_v8 = vpop.permute.xlu0 %724  ;;  %v2073_v31 = vpop.permute.xlu1 %734 }
  0x75   :  { %v2078_v38 = vpop.permute.xlu2 %744 }
  0x7c   :  { %v2054_v17 = vpop.permute.xlu0 %729  ;;  %v2080_v41 = vpop.permute.xlu1 %739 }
  0x7d   :  { %v2099_v57 = vpop.permute.xlu2 %749 }
  0x83   :  { %451 = vmatmul.bf16.gmra.mxu0 %v1304_v48 }
  0x84   :  { %580 = vmatmul.bf16.gmra.mxu3 %v1372_v49  ;;  %540 = vmatmul.bf16.gmra.mxu1 %v1308_v51  ;;  %v2101_v58 = vpop.permute.xlu0 %754 }
  0x93   :  { %456 = vmatmul.bf16.gmra.mxu0 %v1312_v61  ;;  %v2105_v61 = vpop.permute.xlu1 %759 }
  0x94   :  { %585 = vmatmul.bf16.gmra.mxu3 %v1380_v62  ;;  %545 = vmatmul.bf16.gmra.mxu1 %v1316_v0 }
  0x9b   :  { %v2129_v22 = vpop.permute.xlu1 %774 }
  0xa0   :  { %v422_v6 = vpop.f32.mrf.mxu0 }
  0xa1   :  { %v511_v9 = vpop.f32.mrf.mxu1 }
  0xa2   :  { %v512_v10 = vadd.f32 %v511_v9, %v422_v6  ;;  %v2116_v6 = vpop.permute.xlu2 %764  ;;  %v1345_v9 = vld [vmem:[%s2319_s0 + $0xb8] sm:$0xf0] }
  0xa3   :  { %461 = vmatmul.bf16.gmra.mxu0 %v1320_v5 }
  0xa4   :  { %550 = vmatmul.bf16.gmra.mxu1 %v1324_v7  ;;  %v882_v12 = vmul.f32 %v2044_v8, %v512_v10  ;;  %v1515_v7 = vld [vmem:[%s2319_s0 + $0xb4] sm:$0xf]  ;;  %v2124_v10 = vpop.permute.xlu0 %769 }
  0xa6   :  { %v918_v21 = vadd.f32 %v2052_v14, %v882_v12 }
  0xa7   :  { %v2046_v11 = vpop.f32.mrf.mxu3 }
  0xa8   :  { %v424_v13 = vpop.f32.mrf.mxu0  ;;  %v950_v29 = vmax.f32 %v918_v21, 0.0 }
  0xa9   :  { %v513_v15 = vpop.f32.mrf.mxu1 }
  0xaa   :  { %v514_v16 = vadd.f32 %v513_v15, %v424_v13  ;;  %v1344_v15 = vor.u32 %v1516_v4, %v1343_v3 }
  0xac   :  { %v883_v18 = vmul.f32 %v2054_v17, %v514_v16 }
  0xae   :  { %v919_v25 = vadd.f32 %v2052_v14, %v883_v18  ;;  %v1348_v18 = vor.u32 %v1515_v7, %v1345_v9 }
  0xaf   :  { %v2070_v24 = vpop.f32.mrf.mxu3 }
  0xb0   :  { %v427_v27 = vpop.f32.mrf.mxu0  ;;  %v951_v30 = vmax.f32 %v919_v25, 0.0 }
  0xb1   :  { %v516_v32 = vpop.f32.mrf.mxu1 }
  0xb2   :  { %v982_v33 = vpack.c.bf16 %v951_v30, %v950_v29  ;;  %v517_v34 = vadd.f32 %v516_v32, %v427_v27  ;;  %v2133_v27 = vpop.permute.xlu2 %779 }
  0xb3   :  { %466 = vmatmul.bf16.gmra.mxu0 %v1328_v26 }
  0xb4   :  { %555 = vmatmul.bf16.gmra.mxu1 %v1332_v28  ;;  %1070 = vmatmul.bf16.vlgmr.msra.gmra.mxu2 %v982_v33  ;;  %v884_v36 = vmul.f32 %v2073_v31, %v517_v34  ;;  %v2135_v28 = vpop.permute.xlu0 %784  ;;  %v2138_v34 = vpop.permute.xlu1 %789 }
  0xb6   :  { %v920_v45 = vadd.f32 %v2052_v14, %v884_v36 }
  0xb7   :  { %v2075_v35 = vpop.f32.mrf.mxu3 }
  0xb8   :  { %v429_v37 = vpop.f32.mrf.mxu0  ;;  %v952_v53 = vmax.f32 %v920_v45, 0.0 }
  0xb9   :  { %v518_v39 = vpop.f32.mrf.mxu1 }
  0xba   :  { %v519_v40 = vadd.f32 %v518_v39, %v429_v37  ;;  %v2145_v46 = vpop.permute.xlu2 %794 }
  0xbc   :  { %v885_v42 = vmul.f32 %v2080_v41, %v519_v40  ;;  %v2147_v47 = vpop.permute.xlu0 %799 }
  0xbe   :  { %v921_v49 = vadd.f32 %v2052_v14, %v885_v42 }
  0xbf   :  { %v2096_v48 = vpop.f32.mrf.mxu3 }
  0xc0   :  { %v432_v51 = vpop.f32.mrf.mxu0  ;;  %v953_v54 = vmax.f32 %v921_v49, 0.0 }
  0xc1   :  { %v521_v55 = vpop.f32.mrf.mxu1 }
  0xc2   :  { %v983_v56 = vpack.c.bf16 %v953_v54, %v952_v53  ;;  %v522_v59 = vadd.f32 %v521_v55, %v432_v51  ;;  %v2149_v51 = vpop.permute.xlu1 %804 }
  0xc3   :  { %471 = vmatmul.bf16.gmra.mxu0 %v1336_v50 }
  0xc4   :  { %560 = vmatmul.bf16.gmra.mxu1 %v1340_v52  ;;  %1075 = vmatmul.bf16.gmra.mxu2 %v983_v56  ;;  %v886_v62 = vmul.f32 %v2078_v38, %v522_v59 }
  0xc6   :  { %v922_v5 = vadd.f32 %v2052_v14, %v886_v62  ;;  %v2153_v62 = vpop.permute.xlu2 %809 }
  0xc7   :  { %v2103_v60 = vpop.f32.mrf.mxu3 }
  0xc8   :  { %v434_v63 = vpop.f32.mrf.mxu0  ;;  %v954_v19 = vmax.f32 %v922_v5, 0.0 }
  0xc9   :  { %v523_v0 = vpop.f32.mrf.mxu1 }
  0xca   :  { %v524_v1 = vadd.f32 %v523_v0, %v434_v63  ;;  %v2155_v63 = vpop.permute.xlu0 %844  ;;  %v2162_v7 = vpop.permute.xlu1 %849 }
  0xcc   :  { %v887_v2 = vmul.f32 %v2099_v57, %v524_v1 }
  0xce   :  { %v923_v13 = vadd.f32 %v2052_v14, %v887_v2 }
  0xcf   :  { %v2126_v12 = vpop.f32.mrf.mxu3 }
  0xd0   :  { %v437_v16 = vpop.f32.mrf.mxu0  ;;  %v955_v20 = vmax.f32 %v923_v13, 0.0 }
  0xd1   :  { %v526_v21 = vpop.f32.mrf.mxu1 }
  0xd2   :  { %v984_v23 = vpack.c.bf16 %v955_v20, %v954_v19  ;;  %v527_v25 = vadd.f32 %v526_v21, %v437_v16 }
  0xd3   :  { %476 = vmatmul.bf16.gmra.mxu0 %v1344_v15 }
  0xd4   :  { %565 = vmatmul.bf16.gmra.mxu1 %v1348_v18  ;;  %1080 = vmatmul.bf16.gmra.mxu2 %v984_v23  ;;  %v888_v29 = vmul.f32 %v2101_v58, %v527_v25 }
  0xd6   :  { %v924_v37 = vadd.f32 %v2052_v14, %v888_v29  ;;  %v2167_v29 = vpop.permute.xlu2 %814 }
  0xd7   :  { %v2131_v26 = vpop.f32.mrf.mxu3 }
  0xd8   :  { %v439_v30 = vpop.f32.mrf.mxu0  ;;  %v956_v43 = vmax.f32 %v924_v37, 0.0 }
  0xd9   :  { %v528_v32 = vpop.f32.mrf.mxu1 }
  0xda   :  { %v529_v33 = vadd.f32 %v528_v32, %v439_v30 }
  0xdc   :  { %v889_v36 = vmul.f32 %v2105_v61, %v529_v33 }
  0xde   :  { %v925_v40 = vadd.f32 %v2052_v14, %v889_v36 }
  0xdf   :  { %v2142_v39 = vpop.f32.mrf.mxu3 }
  0xe0   :  { %v442_v42 = vpop.f32.mrf.mxu0  ;;  %v957_v44 = vmax.f32 %v925_v40, 0.0 }
  0xe1   :  { %v531_v45 = vpop.f32.mrf.mxu1 }
  0xe2   :  { %v985_v49 = vpack.c.bf16 %v957_v44, %v956_v43  ;;  %v532_v50 = vadd.f32 %v531_v45, %v442_v42  ;;  %v2171_v42 = vpop.permute.xlu1 %854  ;;  %v2173_v43 = vpop.permute.xlu0 %819 }
  0xe4   :  { %1085 = vmatmul.bf16.gmra.mxu2 %v985_v49  ;;  %v890_v53 = vmul.f32 %v2116_v6, %v532_v50 }
  0xe6   :  { %v926_v1 = vadd.f32 %v2052_v14, %v890_v53 }
  0xe7   :  { %v571_v52 = vpop.f32.mrf.mxu3 }
  0xe8   :  { %v444_v54 = vpop.f32.mrf.mxu0  ;;  %v572_v55 = vadd.f32 %v571_v52, %v2046_v11  ;;  %v958_v9 = vmax.f32 %v926_v1, 0.0 }
  0xe9   :  { %v533_v56 = vpop.f32.mrf.mxu1 }
  0xea   :  { %v534_v59 = vadd.f32 %v533_v56, %v444_v54  ;;  %v906_v2 = vmul.f32 %v2155_v63, %v572_v55  ;;  %v2180_v54 = vpop.permute.xlu2 %859 }
  0xec   :  { %v891_v0 = vmul.f32 %v2124_v10, %v534_v59  ;;  %v942_v15 = vadd.f32 %v2052_v14, %v906_v2 }
  0xee   :  { %v927_v4 = vadd.f32 %v2052_v14, %v891_v0  ;;  %v974_v23 = vmax.f32 %v942_v15, 0.0 }
  0xef   :  { %v573_v3 = vpop.f32.mrf.mxu3 }
  0xf0   :  { %v574_v5 = vadd.f32 %v573_v3, %v2070_v24  ;;  %v447_v11 = vpop.f32.mrf.mxu0  ;;  %v959_v13 = vmax.f32 %v927_v4, 0.0 }
  0xf1   :  { %v536_v18 = vpop.f32.mrf.mxu1 }
  0xf2   :  { %v907_v16 = vmul.f32 %v2162_v7, %v574_v5  ;;  %v986_v19 = vpack.c.bf16 %v959_v13, %v958_v9  ;;  %v537_v21 = vadd.f32 %v536_v18, %v447_v11  ;;  %v2185_v9 = vpop.permute.xlu0 %824 }
  0xf4   :  { %v943_v20 = vadd.f32 %v2052_v14, %v907_v16  ;;  %1090 = vmatmul.bf16.gmra.mxu2 %v986_v19  ;;  %v892_v32 = vmul.f32 %v2129_v22, %v537_v21  ;;  %v2189_v21 = vpop.permute.xlu1 %829 }
  0xf6   :  { %v975_v25 = vmax.f32 %v943_v20, 0.0  ;;  %v928_v45 = vadd.f32 %v2052_v14, %v892_v32 }
  0xf7   :  { %v576_v24 = vpop.f32.mrf.mxu3 }
  0xf8   :  { %v994_v30 = vpack.c.bf16 %v975_v25, %v974_v23  ;;  %v449_v33 = vpop.f32.mrf.mxu0  ;;  %v577_v36 = vadd.f32 %v576_v24, %v2075_v35  ;;  %v960_v55 = vmax.f32 %v928_v45, 0.0  ;;  %v2191_v23 = vpop.permute.xlu2 %864 }
  0xf9   :  { %v538_v37 = vpop.f32.mrf.mxu1 }
  0xfa   :  { %1130 = vmatmul.bf16.vlgmr.msra.gmra.mxu3 %v994_v30  ;;  %v539_v40 = vadd.f32 %v538_v37, %v449_v33  ;;  %v908_v49 = vmul.f32 %v2171_v42, %v577_v36  ;;  %v2198_v37 = vpop.permute.xlu0 %869 }
  0xfc   :  { %v893_v44 = vmul.f32 %v2133_v27, %v539_v40  ;;  %v944_v1 = vadd.f32 %v2052_v14, %v908_v49 }
  0xfe   :  { %v929_v52 = vadd.f32 %v2052_v14, %v893_v44  ;;  %v976_v5 = vmax.f32 %v944_v1, 0.0 }
  0xff   :  { %v578_v50 = vpop.f32.mrf.mxu3 }
 0x100   :  { %v579_v53 = vadd.f32 %v578_v50, %v2096_v48  ;;  %v452_v35 = vpop.f32.mrf.mxu0  ;;  %v961_v56 = vmax.f32 %v929_v52, 0.0 }
 0x101   :  { %v541_v0 = vpop.f32.mrf.mxu1 }
 0x102   :  { %v909_v59 = vmul.f32 %v2180_v54, %v579_v53  ;;  %v987_v2 = vpack.c.bf16 %v961_v56, %v960_v55  ;;  %v542_v4 = vadd.f32 %v541_v0, %v452_v35 }
 0x104   :  { %v945_v3 = vadd.f32 %v2052_v14, %v909_v59  ;;  %1095 = vmatmul.bf16.gmra.mxu2 %v987_v2  ;;  %v894_v15 = vmul.f32 %v2135_v28, %v542_v4  ;;  %v2203_v59 = vpop.permute.xlu1 %834 }
 0x106   :  { %v977_v11 = vmax.f32 %v945_v3, 0.0  ;;  %v930_v24 = vadd.f32 %v2052_v14, %v894_v15 }
 0x107   :  { %v581_v48 = vpop.f32.mrf.mxu3 }
 0x108   :  { %v995_v13 = vpack.c.bf16 %v977_v11, %v976_v5  ;;  %v454_v16 = vpop.f32.mrf.mxu0  ;;  %v582_v18 = vadd.f32 %v581_v48, %v2103_v60  ;;  %v962_v40 = vmax.f32 %v930_v24, 0.0  ;;  %v2207_v11 = vpop.permute.xlu0 %874 }
 0x109   :  { %v543_v19 = vpop.f32.mrf.mxu1 }
 0x10a   :  { %1135 = vmatmul.bf16.gmra.mxu3 %v995_v13  ;;  %v544_v20 = vadd.f32 %v543_v19, %v454_v16  ;;  %v910_v30 = vmul.f32 %v2191_v23, %v582_v18 }
 0x10c   :  { %v895_v25 = vmul.f32 %v2138_v34, %v544_v20  ;;  %v946_v50 = vadd.f32 %v2052_v14, %v910_v30  ;;  %v2214_v20 = vpop.permute.xlu1 %879 }
 0x10e   :  { %v931_v33 = vadd.f32 %v2052_v14, %v895_v25  ;;  %v978_v55 = vmax.f32 %v946_v50, 0.0 }
 0x10f   :  { %v583_v32 = vpop.f32.mrf.mxu3 }
 0x110   :  { %v584_v36 = vadd.f32 %v583_v32, %v2126_v12  ;;  %v457_v60 = vpop.f32.mrf.mxu0  ;;  %v963_v44 = vmax.f32 %v931_v33, 0.0 }
 0x111   :  { %v546_v49 = vpop.f32.mrf.mxu1 }
 0x112   :  { %v911_v45 = vmul.f32 %v2198_v37, %v584_v36  ;;  %v988_v52 = vpack.c.bf16 %v963_v44, %v962_v40  ;;  %v547_v35 = vadd.f32 %v546_v49, %v457_v60 }
 0x114   :  { %v947_v53 = vadd.f32 %v2052_v14, %v911_v45  ;;  %1100 = vmatmul.bf16.gmra.mxu2 %v988_v52  ;;  %v896_v1 = vmul.f32 %v2145_v46, %v547_v35 }
 0x116   :  { %v979_v56 = vmax.f32 %v947_v53, 0.0  ;;  %v932_v13 = vadd.f32 %v2052_v14, %v896_v1 }
 0x117   :  { %v586_v12 = vpop.f32.mrf.mxu3 }
 0x118   :  { %v996_v0 = vpack.c.bf16 %v979_v56, %v978_v55  ;;  %v459_v2 = vpop.f32.mrf.mxu0  ;;  %v587_v3 = vadd.f32 %v586_v12, %v2131_v26  ;;  %v964_v26 = vmax.f32 %v932_v13, 0.0 }
 0x119   :  { %v548_v4 = vpop.f32.mrf.mxu1 }
 0x11a   :  { %1140 = vmatmul.bf16.gmra.mxu3 %v996_v0  ;;  %v549_v5 = vadd.f32 %v548_v4, %v459_v2  ;;  %v912_v15 = vmul.f32 %v2207_v11, %v587_v3 }
 0x11c   :  { %v897_v48 = vmul.f32 %v2147_v47, %v549_v5  ;;  %v948_v33 = vadd.f32 %v2052_v14, %v912_v15 }
 0x11e   :  { %v933_v18 = vadd.f32 %v2052_v14, %v897_v48  ;;  %v980_v44 = vmax.f32 %v948_v33, 0.0 }
 0x11f   :  { %v588_v16 = vpop.f32.mrf.mxu3 }
 0x120   :  { %v589_v19 = vadd.f32 %v588_v16, %v2142_v39  ;;  %v462_v25 = vpop.f32.mrf.mxu0  ;;  %v965_v24 = vmax.f32 %v933_v18, 0.0 }
 0x121   :  { %v551_v32 = vpop.f32.mrf.mxu1 }
 0x122   :  { %v913_v30 = vmul.f32 %v2214_v20, %v589_v19  ;;  %v989_v36 = vpack.c.bf16 %v965_v24, %v964_v26  ;;  %v552_v40 = vadd.f32 %v551_v32, %v462_v25 }
 0x124   :  { %v949_v60 = vadd.f32 %v2052_v14, %v913_v30  ;;  %1105 = vmatmul.bf16.gmra.mxu2 %v989_v36  ;;  %v898_v39 = vmul.f32 %v2149_v51, %v552_v40 }
 0x126   :  { %v981_v45 = vmax.f32 %v949_v60, 0.0  ;;  %v934_v55 = vadd.f32 %v2052_v14, %v898_v39 }
 0x128   :  { %v997_v49 = vpack.c.bf16 %v981_v45, %v980_v44  ;;  %v464_v50 = vpop.f32.mrf.mxu0  ;;  %v966_v0 = vmax.f32 %v934_v55, 0.0 }
 0x129   :  { %v553_v52 = vpop.f32.mrf.mxu1 }
 0x12a   :  { %1145 = vmatmul.bf16.gmra.mxu3 %v997_v49  ;;  %v554_v53 = vadd.f32 %v553_v52, %v464_v50 }
 0x12c   :  { %v899_v35 = vmul.f32 %v2153_v62, %v554_v53 }
 0x12e   :  { %v935_v56 = vadd.f32 %v2052_v14, %v899_v35 }
 0x130   :  { %v467_v12 = vpop.f32.mrf.mxu0  ;;  %v967_v1 = vmax.f32 %v935_v56, 0.0 }
 0x131   :  { %v556_v2 = vpop.f32.mrf.mxu1 }
 0x132   :  { %v990_v3 = vpack.c.bf16 %v967_v1, %v966_v0  ;;  %v557_v4 = vadd.f32 %v556_v2, %v467_v12 }
 0x134   :  { %1110 = vmatmul.bf16.gmra.mxu2 %v990_v3  ;;  %v900_v48 = vmul.f32 %v2167_v29, %v557_v4 }
 0x136   :  { %v936_v19 = vadd.f32 %v2052_v14, %v900_v48 }
 0x137   :  { %v1071_v5 = vpop.f32.mrf.mxu2 }
 0x138   :  { %v469_v13 = vpop.f32.mrf.mxu0  ;;  %v1151_v24 = vmul.f32 %v1071_v5, %v2044_v8  ;;  %v968_v33 = vmax.f32 %v936_v19, 0.0  ;;  %v2242_v19 = vpop.permute.xlu2 %839 }
 0x139   :  { %v558_v15 = vpop.f32.mrf.mxu1 }
 0x13a   :  { %v559_v16 = vadd.f32 %v558_v15, %v469_v13 }
 0x13c   :  { %v901_v18 = vmul.f32 %v2173_v43, %v559_v16 }
 0x13e   :  { %v937_v25 = vadd.f32 %v2052_v14, %v901_v18 }
 0x13f   :  { %v1073_v26 = vpop.f32.mrf.mxu2 }
 0x140   :  { %v1152_v30 = vmul.f32 %v1073_v26, %v2054_v17  ;;  %v472_v32 = vpop.f32.mrf.mxu0  ;;  %v969_v36 = vmax.f32 %v937_v25, 0.0 }
 0x141   :  { %v561_v60 = vpop.f32.mrf.mxu1 }
 0x142   :  { %v1536_v40 = vpack.c.bf16 %v1152_v30, %v1151_v24  ;;  %v991_v44 = vpack.c.bf16 %v969_v36, %v968_v33  ;;  %v562_v45 = vadd.f32 %v561_v60, %v472_v32 }
 0x144   :  { %1537 = vst [vmem:[%s2322_s5] sm:$0xff] %v1536_v40   ;;  %1115 = vmatmul.bf16.gmra.mxu2 %v991_v44  ;;  %v902_v39 = vmul.f32 %v2185_v9, %v562_v45 }
 0x146   :  { %v938_v53 = vadd.f32 %v2052_v14, %v902_v39 }
 0x147   :  { %v1076_v49 = vpop.f32.mrf.mxu2 }
 0x148   :  { %v474_v50 = vpop.f32.mrf.mxu0  ;;  %v1153_v56 = vmul.f32 %v1076_v49, %v2073_v31  ;;  %v970_v1 = vmax.f32 %v938_v53, 0.0 }
 0x149   :  { %v563_v52 = vpop.f32.mrf.mxu1 }
 0x14a   :  { %v564_v8 = vadd.f32 %v563_v52, %v474_v50 }
 0x14c   :  { %v903_v17 = vmul.f32 %v2189_v21, %v564_v8 }
 0x14e   :  { %v939_v35 = vadd.f32 %v2052_v14, %v903_v17 }
 0x14f   :  { %v1078_v55 = vpop.f32.mrf.mxu2 }
 0x150   :  { %v1154_v12 = vmul.f32 %v1078_v55, %v2080_v41  ;;  %v477_v0 = vpop.f32.mrf.mxu0  ;;  %v971_v2 = vmax.f32 %v939_v35, 0.0 }
 0x151   :  { %v566_v3 = vpop.f32.mrf.mxu1 }
 0x152   :  { %v1541_v4 = vpack.c.bf16 %v1154_v12, %v1153_v56  ;;  %v992_v5 = vpack.c.bf16 %v971_v2, %v970_v1  ;;  %v567_v48 = vadd.f32 %v566_v3, %v477_v0 }
 0x154   :  { %1613 = vst [vmem:[%s2322_s5 + $0x8] sm:$0xff] %v1541_v4   ;;  %1120 = vmatmul.bf16.gmra.mxu2 %v992_v5  ;;  %v904_v15 = vmul.f32 %v2203_v59, %v567_v48 }
 0x156   :  { %v940_v25 = vadd.f32 %v2052_v14, %v904_v15 }
 0x157   :  { %v1081_v13 = vpop.f32.mrf.mxu2 }
 0x158   :  { %v479_v16 = vpop.f32.mrf.mxu0  ;;  %v1155_v30 = vmul.f32 %v1081_v13, %v2078_v38  ;;  %v972_v33 = vmax.f32 %v940_v25, 0.0 }
 0x159   :  { %v568_v18 = vpop.f32.mrf.mxu1 }
 0x15a   :  { %v569_v31 = vadd.f32 %v568_v18, %v479_v16 }
 0x15c   :  { %v905_v41 = vmul.f32 %v2242_v19, %v569_v31 }
 0x15e   :  { %v941_v26 = vadd.f32 %v2052_v14, %v905_v41 }
 0x15f   :  { %v1083_v24 = vpop.f32.mrf.mxu2 }
 0x160   :  { %v1156_v32 = vmul.f32 %v1083_v24, %v2099_v57  ;;  %v973_v36 = vmax.f32 %v941_v26, 0.0 }
 0x162   :  { %v1546_v60 = vpack.c.bf16 %v1156_v32, %v1155_v30  ;;  %v993_v40 = vpack.c.bf16 %v973_v36, %v972_v33 }
 0x164   :  { %1614 = vst [vmem:[%s2322_s5 + $0x10] sm:$0xff] %v1546_v60   ;;  %1125 = vmatmul.bf16.gmra.mxu2 %v993_v40 }
 0x167   :  { %v1086_v44 = vpop.f32.mrf.mxu2 }
 0x168   :  { %v1157_v49 = vmul.f32 %v1086_v44, %v2101_v58 }
 0x16f   :  { %v1088_v45 = vpop.f32.mrf.mxu2 }
 0x170   :  { %v1158_v14 = vmul.f32 %v1088_v45, %v2105_v61 }
 0x172   :  { %v1551_v39 = vpack.c.bf16 %v1158_v14, %v1157_v49 }
 0x174   :  { %1615 = vst [vmem:[%s2322_s5 + $0x18] sm:$0xff] %v1551_v39  }
 0x177   :  { %v1091_v38 = vpop.f32.mrf.mxu2 }
 0x178   :  { %v1159_v52 = vmul.f32 %v1091_v38, %v2116_v6 }
 0x17d   :  { %v1131_v57 = vpop.f32.mrf.mxu3 }
 0x17e   :  { %v1175_v61 = vmul.f32 %v1131_v57, %v2155_v63 }
 0x17f   :  { %v1093_v50 = vpop.f32.mrf.mxu2 }
 0x180   :  { %v1160_v8 = vmul.f32 %v1093_v50, %v2124_v10 }
 0x182   :  { %v1556_v17 = vpack.c.bf16 %v1160_v8, %v1159_v52 }
 0x184   :  { %1616 = vst [vmem:[%s2322_s5 + $0x20] sm:$0xff] %v1556_v17  }
 0x185   :  { %v1133_v58 = vpop.f32.mrf.mxu3 }
 0x186   :  { %v1176_v53 = vmul.f32 %v1133_v58, %v2162_v7 }
 0x187   :  { %v1096_v55 = vpop.f32.mrf.mxu2 }
 0x188   :  { %v1596_v35 = vpack.c.bf16 %v1176_v53, %v1175_v61  ;;  %v1161_v10 = vmul.f32 %v1096_v55, %v2129_v22 }
 0x18a   :  { %1624 = vst [vmem:[%s2322_s5 + $0x60] sm:$0xff] %v1596_v35  }
 0x18d   :  { %v1136_v56 = vpop.f32.mrf.mxu3 }
 0x18e   :  { %v1177_v7 = vmul.f32 %v1136_v56, %v2171_v42 }
 0x18f   :  { %v1098_v6 = vpop.f32.mrf.mxu2 }
 0x190   :  { %v1162_v12 = vmul.f32 %v1098_v6, %v2133_v27 }
 0x192   :  { %v1561_v0 = vpack.c.bf16 %v1162_v12, %v1161_v10 }
 0x194   :  { %1617 = vst [vmem:[%s2322_s5 + $0x28] sm:$0xff] %v1561_v0  }
 0x195   :  { %v1138_v63 = vpop.f32.mrf.mxu3 }
 0x196   :  { %v1178_v1 = vmul.f32 %v1138_v63, %v2180_v54 }
 0x197   :  { %v1101_v3 = vpop.f32.mrf.mxu2 }
 0x198   :  { %v1601_v2 = vpack.c.bf16 %v1178_v1, %v1177_v7  ;;  %v1163_v27 = vmul.f32 %v1101_v3, %v2135_v28 }
 0x19a   :  { %1625 = vst [vmem:[%s2322_s5 + $0x68] sm:$0xff] %v1601_v2  }
 0x19d   :  { %v1141_v4 = vpop.f32.mrf.mxu3 }
 0x19e   :  { %v1179_v54 = vmul.f32 %v1141_v4, %v2191_v23 }
 0x19f   :  { %v1103_v22 = vpop.f32.mrf.mxu2 }
 0x1a0   :  { %v1164_v5 = vmul.f32 %v1103_v22, %v2138_v34 }
 0x1a2   :  { %v1566_v48 = vpack.c.bf16 %v1164_v5, %v1163_v27 }
 0x1a4   :  { %1618 = vst [vmem:[%s2322_s5 + $0x30] sm:$0xff] %v1566_v48  }
 0x1a5   :  { %v1143_v42 = vpop.f32.mrf.mxu3 }
 0x1a6   :  { %v1180_v13 = vmul.f32 %v1143_v42, %v2198_v37 }
 0x1a7   :  { %v1106_v16 = vpop.f32.mrf.mxu2 }
 0x1a8   :  { %v1606_v15 = vpack.c.bf16 %v1180_v13, %v1179_v54  ;;  %v1165_v34 = vmul.f32 %v1106_v16, %v2145_v46 }
 0x1aa   :  { %1626 = vst [vmem:[%s2322_s5 + $0x70] sm:$0xff] %v1606_v15  }
 0x1ad   :  { %v1146_v18 = vpop.f32.mrf.mxu3 }
 0x1ae   :  { %v1181_v37 = vmul.f32 %v1146_v18, %v2207_v11 }
 0x1af   :  { %v1108_v28 = vpop.f32.mrf.mxu2 }
 0x1b0   :  { %v1166_v31 = vmul.f32 %v1108_v28, %v2147_v47 }
 0x1b2   :  { %v1571_v41 = vpack.c.bf16 %v1166_v31, %v1165_v34 }
 0x1b4   :  { %1619 = vst [vmem:[%s2322_s5 + $0x38] sm:$0xff] %v1571_v41  }
 0x1b5   :  { %v1148_v23 = vpop.f32.mrf.mxu3 }
 0x1b6   :  { %v1182_v25 = vmul.f32 %v1148_v23, %v2214_v20 }
 0x1b7   :  { %v1111_v24 = vpop.f32.mrf.mxu2 }
 0x1b8   :  { %v1611_v26 = vpack.c.bf16 %v1182_v25, %v1181_v37  ;;  %v1167_v46 = vmul.f32 %v1111_v24, %v2149_v51 }
 0x1ba   :  { %1627 = vst [vmem:[%s2322_s5 + $0x78] sm:$0xff] %v1611_v26  }
 0x1bf   :  { %v1113_v30 = vpop.f32.mrf.mxu2 }
 0x1c0   :  { %v1168_v47 = vmul.f32 %v1113_v30, %v2153_v62 }
 0x1c2   :  { %v1576_v32 = vpack.c.bf16 %v1168_v47, %v1167_v46 }
 0x1c4   :  { %1620 = vst [vmem:[%s2322_s5 + $0x40] sm:$0xff] %v1576_v32  }
 0x1c7   :  { %v1116_v33 = vpop.f32.mrf.mxu2 }
 0x1c8   :  { %v1169_v20 = vmul.f32 %v1116_v33, %v2167_v29 }
 0x1cf   :  { %v1118_v11 = vpop.f32.mrf.mxu2 }
 0x1d0   :  { %v1170_v36 = vmul.f32 %v1118_v11, %v2173_v43 }
 0x1d2   :  { %v1581_v60 = vpack.c.bf16 %v1170_v36, %v1169_v20 }
 0x1d4   :  { %1621 = vst [vmem:[%s2322_s5 + $0x48] sm:$0xff] %v1581_v60  }
 0x1d7   :  { %v1121_v40 = vpop.f32.mrf.mxu2 }
 0x1d8   :  { %v1171_v62 = vmul.f32 %v1121_v40, %v2185_v9 }
 0x1df   :  { %v1123_v51 = vpop.f32.mrf.mxu2 }
 0x1e0   :  { %v1172_v44 = vmul.f32 %v1123_v51, %v2189_v21 }
 0x1e2   :  { %v1586_v45 = vpack.c.bf16 %v1172_v44, %v1171_v62 }
 0x1e4   :  { %1622 = vst [vmem:[%s2322_s5 + $0x50] sm:$0xff] %v1586_v45  }
 0x1e7   :  { %v1126_v49 = vpop.f32.mrf.mxu2 }
 0x1e8   :  { %v1173_v43 = vmul.f32 %v1126_v49, %v2203_v59 }
 0x1ef   :  { %v1128_v29 = vpop.f32.mrf.mxu2 }
 0x1f0   :  { %v1174_v14 = vmul.f32 %v1128_v29, %v2242_v19 }
 0x1f2   :  { %v1591_v39 = vpack.c.bf16 %v1174_v14, %v1173_v43 }
 0x1f4   :  { %1623 = vst [vmem:[%s2322_s5 + $0x58] sm:$0xff] %v1591_v39  }

// kernel: gcn_encoder.3
= control target key start
LH: loop header
LB: loop body
LE: loop exit
PB: predicated region body
PF: predicated region fallthrough
CT: control target
= control target key end

     0   :  { %v1470_v0 = vmov 0   ;;  %s2271_s3 = inlined_call_operand.vmem [shape: f32[256,1], index: 3, kind: input, shape index: {}]   ;;  %s2272_s1 = inlined_call_operand.vmem [shape: bf16[256,128], index: 1, kind: input, shape index: {}]   ;;  %s2273_s0 = inlined_call_operand.vmem [shape: bf16[256,256], index: 0, kind: input, shape index: {}]   ;;  %s2274_s2 = inlined_call_operand.vmem [shape: f32[1,128], index: 2, kind: input, shape index: {}]   ;;  %s2275_s4 = inlined_call_operand.vmem [shape: f32[256,128], index: 4, kind: output, shape index: {}]  }
   0x1   :  { %1468 = vset.pattern.permute.xlu2 %v1470_v0  ;;  %1467 = vset.pattern.permute.xlu1 %v1470_v0  ;;  %v1501_v1 = vld [vmem:[%s2271_s3 + $0x20] sm:$0xff]  ;;  %v1506_v2 = vld [vmem:[%s2271_s3 + $0x10] sm:$0xff]  ;;  %v1408_v4 = vld [vmem:[%s2272_s1 + $0x38] sm:$0xff] }
   0x2   :  { %v1511_v3 = vld [vmem:[%s2271_s3] sm:$0xff]  ;;  %1466 = vset.pattern.permute.xlu0 %v1470_v0  ;;  %741 = vperm.xlu2 %1468, %v1501_v1   ;;  %v1416_v5 = vld [vmem:[%s2272_s1 + $0x78] sm:$0xff]  ;;  %v1407_v6 = vld [vmem:[%s2272_s1 + $0x30] sm:$0xff]  ;;  %vm949_vm2 = vcmp.gt.f32.partialorder %v1506_v2, 0.0  ;;  %vm951_vm4 = vcmp.gt.f32.partialorder %v1501_v1, 0.0 }
   0x3   :  { %731 = vperm.xlu1 %1467, %v1506_v2   ;;  %721 = vperm.xlu0 %1466, %v1511_v3   ;;  %v1415_v7 = vld [vmem:[%s2272_s1 + $0x70] sm:$0xff]  ;;  %v1532_v8 = vld [vmem:[%s2271_s3 + $0x28] sm:$0xff]  ;;  %v1537_v9 = vld [vmem:[%s2271_s3 + $0x18] sm:$0xff]  ;;  %vm947_vm0 = vcmp.gt.f32.partialorder %v1511_v3, 0.0 }
   0x4   :  { %410 = vmatpush.bf16.msra.mxu0 %v1408_v4  ;;  %1449 = vmatpush.bf16.msra.mxu2 %v1408_v4  ;;  %v1542_v10 = vld [vmem:[%s2271_s3 + $0x8] sm:$0xff]  ;;  %v1405_v13 = vld [vmem:[%s2272_s1 + $0x20] sm:$0xff]  ;;  %v1567_v16 = vld [vmem:[%s2271_s3 + $0x38] sm:$0xff]  ;;  %vm950_vm1 = vcmp.gt.f32.partialorder %v1537_v9, 0.0  ;;  %vm952_vm5 = vcmp.gt.f32.partialorder %v1532_v8, 0.0 }
   0x5   :  { %499 = vmatpush.bf16.msra.mxu1 %v1416_v5  ;;  %1457 = vmatpush.bf16.msra.mxu3 %v1416_v5  ;;  %v1406_v11 = vld [vmem:[%s2272_s1 + $0x28] sm:$0xff]  ;;  %v1413_v14 = vld [vmem:[%s2272_s1 + $0x60] sm:$0xff]  ;;  %v1572_v17 = vld [vmem:[%s2271_s3 + $0x30] sm:$0xff]  ;;  %vm948_vm3 = vcmp.gt.f32.partialorder %v1542_v10, 0.0  ;;  %vm954_vm9 = vcmp.gt.f32.partialorder %v1567_v16, 0.0 }
   0x6   :  { %v1414_v12 = vld [vmem:[%s2272_s1 + $0x68] sm:$0xff]  ;;  %v1562_v15 = vld [vmem:[%s2271_s3 + $0x40] sm:$0xff]  ;;  %v1404_v18 = vld [vmem:[%s2272_s1 + $0x18] sm:$0xff]  ;;  %vm953_vm6 = vcmp.gt.f32.partialorder %v1572_v17, 0.0 }
   0x7   :  { %v1412_v19 = vld [vmem:[%s2272_s1 + $0x58] sm:$0xff]  ;;  %v1403_v20 = vld [vmem:[%s2272_s1 + $0x10] sm:$0xff]  ;;  %v1602_v24 = vld [vmem:[%s2271_s3 + $0x48] sm:$0xff]  ;;  %vm955_vm8 = vcmp.gt.f32.partialorder %v1562_v15, 0.0 }
   0x8   :  { %411 = vmatpush.bf16.msra.mxu0 %v1407_v6  ;;  %1450 = vmatpush.bf16.msra.mxu2 %v1407_v6  ;;  %v1411_v21 = vld [vmem:[%s2272_s1 + $0x50] sm:$0xff]  ;;  %v1592_v22 = vld [vmem:[%s2271_s3 + $0x58] sm:$0xff]  ;;  %v1402_v25 = vld [vmem:[%s2272_s1 + $0x8] sm:$0xff]  ;;  %vm956_vm7 = vcmp.gt.f32.partialorder %v1602_v24, 0.0 }
   0x9   :  { %500 = vmatpush.bf16.msra.mxu1 %v1415_v7  ;;  %1458 = vmatpush.bf16.msra.mxu3 %v1415_v7  ;;  %v1597_v23 = vld [vmem:[%s2271_s3 + $0x50] sm:$0xff]  ;;  %v1410_v26 = vld [vmem:[%s2272_s1 + $0x48] sm:$0xff]  ;;  %v1401_v27 = vld [vmem:[%s2272_s1] sm:$0xff]  ;;  %v988_v1 = vsel %vm956_vm7, 1, %v1470_v0  ;;  %vm958_vm11 = vcmp.gt.f32.partialorder %v1592_v22, 0.0 }
   0xa   :  { %746 = vperm.xlu2 %1468, %v1532_v8   ;;  %v1409_v28 = vld [vmem:[%s2272_s1 + $0x40] sm:$0xff]  ;;  %v1418_v30 = vld [vmem:[%s2273_s0 + $0x4] sm:$0xf0]  ;;  %v1213_v34 = vld [vmem:[%s2273_s0 + $0x8] sm:$0xf0]  ;;  %vm957_vm12 = vcmp.gt.f32.partialorder %v1597_v23, 0.0 }
   0xb   :  { %736 = vperm.xlu1 %1467, %v1537_v9   ;;  %726 = vperm.xlu0 %1466, %v1542_v10   ;;  %v1211_v29 = vld [vmem:[%s2273_s0] sm:$0xf]  ;;  %v1434_v32 = vld [vmem:[%s2273_s0 + $0x84] sm:$0xf0]  ;;  %v1417_v33 = vld [vmem:[%s2273_s0 + $0x4] sm:$0xf] }
   0xc   :  { %412 = vmatpush.bf16.msra.mxu0 %v1406_v11  ;;  %1451 = vmatpush.bf16.msra.mxu2 %v1406_v11  ;;  %v1275_v31 = vld [vmem:[%s2273_s0 + $0x80] sm:$0xf]  ;;  %v1433_v35 = vld [vmem:[%s2273_s0 + $0x84] sm:$0xf]  ;;  %v1277_v36 = vld [vmem:[%s2273_s0 + $0x88] sm:$0xf0]  ;;  %v1212_v40 = vor.u32 %v1418_v30, %v1211_v29  ;;  %v1216_v42 = vor.u32 %v1417_v33, %v1213_v34 }
   0xd   :  { %501 = vmatpush.bf16.msra.mxu1 %v1414_v12  ;;  %1459 = vmatpush.bf16.msra.mxu3 %v1414_v12  ;;  %v1646_v37 = vld [vmem:[%s2271_s3 + $0x70] sm:$0xff]  ;;  %v1651_v38 = vld [vmem:[%s2271_s3 + $0x68] sm:$0xff]  ;;  %v1656_v39 = vld [vmem:[%s2271_s3 + $0x60] sm:$0xff]  ;;  %v1276_v41 = vor.u32 %v1434_v32, %v1275_v31  ;;  %v1280_v43 = vor.u32 %v1433_v35, %v1277_v36 }
   0xe   :  { %v1664_v44 = vld [vmem:[%s2271_s3 + $0x88] sm:$0xff]  ;;  %v1669_v45 = vld [vmem:[%s2271_s3 + $0x80] sm:$0xff]  ;;  %v1674_v46 = vld [vmem:[%s2271_s3 + $0x78] sm:$0xff]  ;;  %vm959_vm10 = vcmp.gt.f32.partialorder %v1656_v39, 0.0  ;;  %vm961_vm14 = vcmp.gt.f32.partialorder %v1646_v37, 0.0  ;;  %vm960_vm15 = vcmp.gt.f32.partialorder %v1651_v38, 0.0 }
   0xf   :  { %v1219_v47 = vld [vmem:[%s2273_s0 + $0x10] sm:$0xf]  ;;  %v1420_v48 = vld [vmem:[%s2273_s0 + $0x14] sm:$0xf0]  ;;  %v1419_v51 = vld [vmem:[%s2273_s0 + $0x14] sm:$0xf] }
  0x10   :  { %413 = vmatpush.bf16.msra.mxu0 %v1405_v13  ;;  %1452 = vmatpush.bf16.msra.mxu2 %v1405_v13  ;;  %v1283_v49 = vld [vmem:[%s2273_s0 + $0x90] sm:$0xf]  ;;  %v1436_v50 = vld [vmem:[%s2273_s0 + $0x94] sm:$0xf0]  ;;  %v1221_v52 = vld [vmem:[%s2273_s0 + $0x18] sm:$0xf0]  ;;  %v1220_v58 = vor.u32 %v1420_v48, %v1219_v47 }
  0x11   :  { %502 = vmatpush.bf16.msra.mxu1 %v1413_v14  ;;  %1460 = vmatpush.bf16.msra.mxu3 %v1413_v14  ;;  %v1435_v53 = vld [vmem:[%s2273_s0 + $0x94] sm:$0xf]  ;;  %v1285_v54 = vld [vmem:[%s2273_s0 + $0x98] sm:$0xf0]  ;;  %v1706_v55 = vld [vmem:[%s2271_s3 + $0xa0] sm:$0xff]  ;;  %v1284_v59 = vor.u32 %v1436_v50, %v1283_v49  ;;  %v1224_v60 = vor.u32 %v1419_v51, %v1221_v52  ;;  %v982_v52 = vsel %vm950_vm1, 1, %v1470_v0 }
  0x12   :  { %761 = vperm.xlu2 %1468, %v1562_v15   ;;  %v1711_v56 = vld [vmem:[%s2271_s3 + $0x98] sm:$0xff]  ;;  %v1716_v57 = vld [vmem:[%s2271_s3 + $0x90] sm:$0xff]  ;;  %v1288_v61 = vor.u32 %v1435_v53, %v1285_v54  ;;  %v1734_v4 = vld [vmem:[%s2271_s3 + $0xa8] sm:$0xff]  ;;  %v981_v53 = vsel %vm949_vm2, 1, %v1470_v0  ;;  %v980_v54 = vsel %vm948_vm3, 1, %v1470_v0  ;;  %vm962_vm13 = vcmp.gt.f32.partialorder %v1674_v46, 0.0 }
  0x13   :  { %756 = vperm.xlu1 %1467, %v1567_v16   ;;  %751 = vperm.xlu0 %1466, %v1572_v17   ;;  %v1724_v62 = vld [vmem:[%s2271_s3 + $0xb8] sm:$0xff]  ;;  %v1729_v63 = vld [vmem:[%s2271_s3 + $0xb0] sm:$0xff]  ;;  %v1227_v5 = vld [vmem:[%s2273_s0 + $0x20] sm:$0xf]  ;;  %vm964_vm1 = vcmp.gt.f32.partialorder %v1664_v44, 0.0  ;;  %vm963_vm2 = vcmp.gt.f32.partialorder %v1669_v45, 0.0 }
  0x14   :  { %414 = vmatpush.bf16.msra.mxu0 %v1404_v18  ;;  %1453 = vmatpush.bf16.msra.mxu2 %v1404_v18  ;;  %v1422_v6 = vld [vmem:[%s2273_s0 + $0x24] sm:$0xf0]  ;;  %v1291_v7 = vld [vmem:[%s2273_s0 + $0xa0] sm:$0xf]  ;;  %v1421_v12 = vld [vmem:[%s2273_s0 + $0x24] sm:$0xf] }
  0x15   :  { %503 = vmatpush.bf16.msra.mxu1 %v1412_v19  ;;  %1461 = vmatpush.bf16.msra.mxu3 %v1412_v19  ;;  %v1438_v11 = vld [vmem:[%s2273_s0 + $0xa4] sm:$0xf0]  ;;  %v1229_v13 = vld [vmem:[%s2273_s0 + $0x28] sm:$0xf0]  ;;  %v1437_v14 = vld [vmem:[%s2273_s0 + $0xa4] sm:$0xf] }
  0x16   :  { %v1293_v18 = vld [vmem:[%s2273_s0 + $0xa8] sm:$0xf0]  ;;  %v1766_v19 = vld [vmem:[%s2271_s3 + $0xd0] sm:$0xff]  ;;  %v1789_v30 = vld [vmem:[%s2271_s3 + $0xe0] sm:$0xff]  ;;  %vm968_vm3 = vcmp.gt.f32.partialorder %v1734_v4, 0.0  ;;  %vm970_vm7 = vcmp.gt.f32.partialorder %v1724_v62, 0.0 }
  0x17   :  { %v1784_v29 = vld [vmem:[%s2271_s3 + $0xe8] sm:$0xff]  ;;  %v1794_v31 = vld [vmem:[%s2271_s3 + $0xd8] sm:$0xff]  ;;  %v1235_v32 = vld [vmem:[%s2273_s0 + $0x30] sm:$0xf] }
  0x18   :  { %415 = vmatpush.bf16.msra.mxu0 %v1403_v20  ;;  %1454 = vmatpush.bf16.msra.mxu2 %v1403_v20  ;;  %v1771_v20 = vld [vmem:[%s2271_s3 + $0xc8] sm:$0xff]  ;;  %v1424_v33 = vld [vmem:[%s2273_s0 + $0x34] sm:$0xf0]  ;;  %v1299_v34 = vld [vmem:[%s2273_s0 + $0xb0] sm:$0xf] }
  0x19   :  { %504 = vmatpush.bf16.msra.mxu1 %v1411_v21  ;;  %1462 = vmatpush.bf16.msra.mxu3 %v1411_v21  ;;  %v1776_v21 = vld [vmem:[%s2271_s3 + $0xc0] sm:$0xff]  ;;  %v1440_v35 = vld [vmem:[%s2273_s0 + $0xb4] sm:$0xf0]  ;;  %v1423_v3 = vld [vmem:[%s2273_s0 + $0x34] sm:$0xf]  ;;  %v1236_v48 = vor.u32 %v1424_v33, %v1235_v32 }
  0x1a   :  { %776 = vperm.xlu2 %1468, %v1592_v22   ;;  %v1237_v36 = vld [vmem:[%s2273_s0 + $0x38] sm:$0xf0]  ;;  %v1833_v47 = vld [vmem:[%s2271_s3 + $0xf0] sm:$0xff]  ;;  %v1300_v49 = vor.u32 %v1440_v35, %v1299_v34  ;;  %v1243_v2 = vld [vmem:[%s2273_s0 + $0x40] sm:$0xf]  ;;  %v990_v34 = vsel %vm958_vm11, 1, %v1470_v0 }
  0x1b   :  { %771 = vperm.xlu1 %1467, %v1597_v23   ;;  %766 = vperm.xlu0 %1466, %v1602_v24   ;;  %v1240_v50 = vor.u32 %v1423_v3, %v1237_v36  ;;  %v1426_v9 = vld [vmem:[%s2273_s0 + $0x44] sm:$0xf0]  ;;  %v1307_v10 = vld [vmem:[%s2273_s0 + $0xc0] sm:$0xf]  ;;  %v1425_v8 = vld [vmem:[%s2273_s0 + $0x44] sm:$0xf] }
  0x1c   :  { %416 = vmatpush.bf16.msra.mxu0 %v1402_v25  ;;  %1455 = vmatpush.bf16.msra.mxu2 %v1402_v25  ;;  %v1228_v25 = vor.u32 %v1422_v6, %v1227_v5  ;;  %v1245_v17 = vld [vmem:[%s2273_s0 + $0x48] sm:$0xf0]  ;;  %v985_v5 = vsel %vm953_vm6, 1, %v1470_v0  ;;  %v984_v6 = vsel %vm952_vm5, 1, %v1470_v0  ;;  %v1428_v15 = vld [vmem:[%s2273_s0 + $0x54] sm:$0xf0] }
  0x1d   :  { %505 = vmatpush.bf16.msra.mxu1 %v1410_v26  ;;  %1463 = vmatpush.bf16.msra.mxu3 %v1410_v26  ;;  %v1292_v26 = vor.u32 %v1438_v11, %v1291_v7  ;;  %v983_v7 = vsel %vm951_vm4, 1, %v1470_v0  ;;  %v1244_v11 = vor.u32 %v1426_v9, %v1243_v2  ;;  %v1315_v16 = vld [vmem:[%s2273_s0 + $0xd0] sm:$0xf]  ;;  %v1253_v32 = vld [vmem:[%s2273_s0 + $0x58] sm:$0xf0]  ;;  %v991_v23 = vsel %vm959_vm10, 1, %v1470_v0 }
  0x1e   :  { %v1443_v33 = vld [vmem:[%s2273_s0 + $0xd4] sm:$0xf]  ;;  %v1317_v22 = vld [vmem:[%s2273_s0 + $0xd8] sm:$0xf0]  ;;  %v989_v35 = vsel %vm957_vm12, 1, %v1470_v0  ;;  %vm967_vm4 = vcmp.gt.f32.partialorder %v1706_v55, 0.0 }
  0x1f   :  { %v1429_v9 = vld [vmem:[%s2273_s0 + $0x64] sm:$0xf]  ;;  %vm966_vm5 = vcmp.gt.f32.partialorder %v1711_v56, 0.0  ;;  %vm971_vm6 = vcmp.gt.f32.partialorder %v1776_v21, 0.0  ;;  %vm973_vm10 = vcmp.gt.f32.partialorder %v1766_v19, 0.0  ;;  %vm972_vm11 = vcmp.gt.f32.partialorder %v1771_v20, 0.0 }
  0x20   :  { %417 = vmatpush.bf16.msra.mxu0 %v1401_v27  ;;  %1456 = vmatpush.bf16.msra.mxu2 %v1401_v27  ;;  %v1232_v27 = vor.u32 %v1421_v12, %v1229_v13  ;;  %v1248_v13 = vor.u32 %v1425_v8, %v1245_v17  ;;  %v996_v8 = vsel %vm964_vm1, 1, %v1470_v0  ;;  %v995_v17 = vsel %vm963_vm2, 1, %v1470_v0 }
  0x21   :  { %506 = vmatpush.bf16.msra.mxu1 %v1409_v28  ;;  %1464 = vmatpush.bf16.msra.mxu3 %v1409_v28  ;;  %v1296_v28 = vor.u32 %v1437_v14, %v1293_v18  ;;  %vm977_vm12 = vcmp.gt.f32.partialorder %v1833_v47, 0.0 }
  0x22   :  { %791 = vperm.xlu2 %1468, %v1646_v37   ;;  %v1430_v37 = vld [vmem:[%s2273_s0 + $0x64] sm:$0xf0] }
  0x23   :  { %786 = vperm.xlu1 %1467, %v1651_v38   ;;  %781 = vperm.xlu0 %1466, %v1656_v39   ;;  %v1427_v39 = vld [vmem:[%s2273_s0 + $0x54] sm:$0xf]  ;;  %v1323_v38 = vld [vmem:[%s2273_s0 + $0xe0] sm:$0xf] }
  0x24   :  { %418 = vmatmul.bf16.vlgmr.msra.gmra.mxu0 %v1212_v40  ;;  %458 = vmatmul.bf16.vlgmr.msra.gmra.mxu2 %v1276_v41  ;;  %v1439_v40 = vld [vmem:[%s2273_s0 + $0xb4] sm:$0xf]  ;;  %v1301_v41 = vld [vmem:[%s2273_s0 + $0xb8] sm:$0xf0] }
  0x25   :  { %507 = vmatmul.bf16.vlgmr.msra.gmra.mxu1 %v1216_v42  ;;  %547 = vmatmul.bf16.vlgmr.msra.gmra.mxu3 %v1280_v43  ;;  %v979_v42 = vsel %vm947_vm0, 1, %v1470_v0  ;;  %v1828_v43 = vld [vmem:[%s2271_s3 + $0xf8] sm:$0xff]  ;;  %v1304_v51 = vor.u32 %v1439_v40, %v1301_v41  ;;  %v1256_v40 = vor.u32 %v1427_v39, %v1253_v32  ;;  %v1320_v41 = vor.u32 %v1443_v33, %v1317_v22 }
  0x26   :  { %vm965_vm0 = vcmp.gt.f32.partialorder %v1716_v57, 0.0  ;;  %v1002_v39 = vsel %vm970_vm7, 1, %v1470_v0 }
  0x2a   :  { %806 = vperm.xlu2 %1468, %v1664_v44   ;;  %v1325_v44 = vld [vmem:[%s2273_s0 + $0xe8] sm:$0xf0] }
  0x2b   :  { %801 = vperm.xlu1 %1467, %v1669_v45   ;;  %796 = vperm.xlu0 %1466, %v1674_v46   ;;  %v1259_v46 = vld [vmem:[%s2273_s0 + $0x60] sm:$0xf]  ;;  %v997_v45 = vsel %vm965_vm0, 1, %v1470_v0 }
  0x32   :  { %821 = vperm.xlu2 %1468, %v1706_v55   ;;  %v1432_v55 = vld [vmem:[%s2273_s0 + $0x74] sm:$0xf0] }
  0x33   :  { %816 = vperm.xlu1 %1467, %v1711_v56   ;;  %811 = vperm.xlu0 %1466, %v1716_v57   ;;  %v1446_v57 = vld [vmem:[%s2273_s0 + $0xe4] sm:$0xf0]  ;;  %v1331_v56 = vld [vmem:[%s2273_s0 + $0xf0] sm:$0xf] }
  0x34   :  { %423 = vmatmul.bf16.gmra.mxu0 %v1220_v58  ;;  %463 = vmatmul.bf16.gmra.mxu2 %v1284_v59  ;;  %v1442_v59 = vld [vmem:[%s2273_s0 + $0xc4] sm:$0xf0] }
  0x35   :  { %512 = vmatmul.bf16.gmra.mxu1 %v1224_v60  ;;  %552 = vmatmul.bf16.gmra.mxu3 %v1288_v61  ;;  %v1441_v60 = vld [vmem:[%s2273_s0 + $0xc4] sm:$0xf]  ;;  %v1309_v61 = vld [vmem:[%s2273_s0 + $0xc8] sm:$0xf0]  ;;  %v1308_v12 = vor.u32 %v1442_v59, %v1307_v10 }
  0x36   :  { %v1312_v14 = vor.u32 %v1441_v60, %v1309_v61  ;;  %v1261_v10 = vld [vmem:[%s2273_s0 + $0x68] sm:$0xf0]  ;;  %v1445_v59 = vld [vmem:[%s2273_s0 + $0xe4] sm:$0xf]  ;;  %v1260_v60 = vor.u32 %v1430_v37, %v1259_v46  ;;  %v1324_v61 = vor.u32 %v1446_v57, %v1323_v38 }
  0x3a   :  { %836 = vperm.xlu2 %1468, %v1724_v62   ;;  %v1333_v62 = vld [vmem:[%s2273_s0 + $0xf8] sm:$0xf0] }
  0x3b   :  { %831 = vperm.xlu1 %1467, %v1729_v63   ;;  %826 = vperm.xlu0 %1466, %v1734_v4   ;;  %v1267_v4 = vld [vmem:[%s2273_s0 + $0x70] sm:$0xf] }
  0x3c   :  { %v1268_v33 = vor.u32 %v1432_v55, %v1267_v4 }
  0x42   :  { %851 = vperm.xlu2 %1468, %v1766_v19   ;;  %v1009_v19 = vsel %vm977_vm12, 1, %v1470_v0 }
  0x43   :  { %846 = vperm.xlu1 %1467, %v1771_v20   ;;  %841 = vperm.xlu0 %1466, %v1776_v21   ;;  %v1448_v21 = vld [vmem:[%s2273_s0 + $0xf4] sm:$0xf0] }
  0x44   :  { %428 = vmatmul.bf16.gmra.mxu0 %v1228_v25  ;;  %468 = vmatmul.bf16.gmra.mxu2 %v1292_v26  ;;  %v987_v25 = vsel %vm955_vm8, 1, %v1470_v0  ;;  %v986_v26 = vsel %vm954_vm9, 1, %v1470_v0  ;;  %vm969_vm8 = vcmp.gt.f32.partialorder %v1729_v63, 0.0  ;;  %v1003_v63 = vsel %vm971_vm6, 1, %v1470_v0 }
  0x45   :  { %517 = vmatmul.bf16.gmra.mxu1 %v1232_v27  ;;  %557 = vmatmul.bf16.gmra.mxu3 %v1296_v28  ;;  %v1251_v27 = vld [vmem:[%s2273_s0 + $0x50] sm:$0xf]  ;;  %v1444_v28 = vld [vmem:[%s2273_s0 + $0xd4] sm:$0xf0]  ;;  %v1001_v32 = vsel %vm969_vm8, 1, %v1470_v0  ;;  %v1332_v22 = vor.u32 %v1448_v21, %v1331_v56  ;;  %vm974_vm9 = vcmp.gt.f32.partialorder %v1794_v31, 0.0 }
  0x46   :  { %v1252_v3 = vor.u32 %v1428_v15, %v1251_v27  ;;  %v1316_v36 = vor.u32 %v1444_v28, %v1315_v16  ;;  %v1431_v15 = vld [vmem:[%s2273_s0 + $0x74] sm:$0xf]  ;;  %v1269_v16 = vld [vmem:[%s2273_s0 + $0x78] sm:$0xf0] }
  0x47   :  { %v1447_v28 = vld [vmem:[%s2273_s0 + $0xf4] sm:$0xf] }
  0x4a   :  { %866 = vperm.xlu2 %1468, %v1784_v29  }
  0x4b   :  { %861 = vperm.xlu1 %1467, %v1789_v30   ;;  %856 = vperm.xlu0 %1466, %v1794_v31  }
  0x52   :  { %1012 = vperm.xlu2 %1468, %v979_v42  }
  0x53   :  { %876 = vperm.xlu1 %1467, %v1828_v43   ;;  %871 = vperm.xlu0 %1466, %v1833_v47  }
  0x54   :  { %433 = vmatmul.bf16.gmra.mxu0 %v1236_v48  ;;  %473 = vmatmul.bf16.gmra.mxu2 %v1300_v49 }
  0x55   :  { %522 = vmatmul.bf16.gmra.mxu1 %v1240_v50  ;;  %562 = vmatmul.bf16.gmra.mxu3 %v1304_v51  ;;  %v994_v50 = vsel %vm962_vm13, 1, %v1470_v0  ;;  %v993_v51 = vsel %vm961_vm14, 1, %v1470_v0  ;;  %vm976_vm13 = vcmp.gt.f32.partialorder %v1784_v29, 0.0  ;;  %vm975_vm14 = vcmp.gt.f32.partialorder %v1789_v30, 0.0 }
  0x56   :  { %v1008_v20 = vsel %vm976_vm13, 1, %v1470_v0  ;;  %v1007_v46 = vsel %vm975_vm14, 1, %v1470_v0 }
  0x5a   :  { %1021 = vperm.xlu2 %1468, %v982_v52   ;;  %v992_v52 = vsel %vm960_vm15, 1, %v1470_v0  ;;  %vm978_vm15 = vcmp.gt.f32.partialorder %v1828_v43, 0.0 }
  0x5b   :  { %1018 = vperm.xlu1 %1467, %v981_v53   ;;  %1015 = vperm.xlu0 %1466, %v980_v54  }
  0x5c   :  { %v1844_v58 = vpop.permute.xlu2 %741 }
  0x62   :  { %1030 = vperm.xlu2 %1468, %v985_v5   ;;  %v1264_v5 = vor.u32 %v1429_v9, %v1261_v10 }
  0x63   :  { %1027 = vperm.xlu1 %1467, %v984_v6   ;;  %1024 = vperm.xlu0 %1466, %v983_v7   ;;  %v1328_v6 = vor.u32 %v1445_v59, %v1325_v44  ;;  %v1010_v44 = vsel %vm978_vm15, 1, %v1470_v0 }
  0x64   :  { %438 = vmatmul.bf16.gmra.mxu0 %v1244_v11  ;;  %478 = vmatmul.bf16.gmra.mxu2 %v1308_v12  ;;  %v1877_v18 = vpop.permute.xlu2 %746 }
  0x65   :  { %527 = vmatmul.bf16.gmra.mxu1 %v1248_v13  ;;  %567 = vmatmul.bf16.gmra.mxu3 %v1312_v14  ;;  %v1000_v13 = vsel %vm968_vm3, 1, %v1470_v0  ;;  %v999_v14 = vsel %vm967_vm4, 1, %v1470_v0 }
  0x6a   :  { %1039 = vperm.xlu2 %1468, %v988_v1   ;;  %v998_v1 = vsel %vm966_vm5, 1, %v1470_v0 }
  0x6b   :  { %1036 = vperm.xlu1 %1467, %v987_v25   ;;  %1033 = vperm.xlu0 %1466, %v986_v26  }
  0x6c   :  { %v1888_v24 = vpop.permute.xlu2 %761 }
  0x72   :  { %1048 = vperm.xlu2 %1468, %v991_v23   ;;  %v1272_v23 = vor.u32 %v1431_v15, %v1269_v16 }
  0x73   :  { %1045 = vperm.xlu1 %1467, %v990_v34   ;;  %1042 = vperm.xlu0 %1466, %v989_v35   ;;  %v1336_v34 = vor.u32 %v1447_v28, %v1333_v62 }
  0x74   :  { %443 = vmatmul.bf16.gmra.mxu0 %v1252_v3  ;;  %483 = vmatmul.bf16.gmra.mxu2 %v1316_v36  ;;  %v1917_v42 = vpop.permute.xlu2 %776 }
  0x75   :  { %532 = vmatmul.bf16.gmra.mxu1 %v1256_v40  ;;  %572 = vmatmul.bf16.gmra.mxu3 %v1320_v41  ;;  %v1920_v48 = vpop.permute.xlu1 %731  ;;  %v1922_v49 = vpop.permute.xlu0 %721  ;;  %v1006_v40 = vsel %vm974_vm9, 1, %v1470_v0  ;;  %v1005_v41 = vsel %vm973_vm10, 1, %v1470_v0 }
  0x7a   :  { %1057 = vperm.xlu2 %1468, %v994_v50   ;;  %v1004_v50 = vsel %vm972_vm11, 1, %v1470_v0 }
  0x7b   :  { %1054 = vperm.xlu1 %1467, %v993_v51   ;;  %1051 = vperm.xlu0 %1466, %v992_v52  }
  0x7c   :  { %v1932_v53 = vpop.permute.xlu2 %791 }
  0x7d   :  { %v1941_v54 = vpop.permute.xlu1 %736  ;;  %v1943_v2 = vpop.permute.xlu0 %726 }
  0x82   :  { %1066 = vperm.xlu2 %1468, %v997_v45   ;;  %v2047_v45 = vld [vmem:[%s2274_s2] ss:$0 sm:$0xff] }
  0x83   :  { %1063 = vperm.xlu1 %1467, %v996_v8   ;;  %1060 = vperm.xlu0 %1466, %v995_v17  }
  0x84   :  { %448 = vmatmul.bf16.gmra.mxu0 %v1260_v60  ;;  %488 = vmatmul.bf16.gmra.mxu2 %v1324_v61  ;;  %v1965_v7 = vpop.permute.xlu2 %806 }
  0x85   :  { %537 = vmatmul.bf16.gmra.mxu1 %v1264_v5  ;;  %577 = vmatmul.bf16.gmra.mxu3 %v1328_v6  ;;  %v1968_v11 = vpop.permute.xlu1 %756  ;;  %v1970_v12 = vpop.permute.xlu0 %751 }
  0x8a   :  { %1075 = vperm.xlu2 %1468, %v1000_v13  }
  0x8b   :  { %1072 = vperm.xlu1 %1467, %v999_v14   ;;  %1069 = vperm.xlu0 %1466, %v998_v1  }
  0x8c   :  { %v1980_v25 = vpop.permute.xlu2 %821 }
  0x8d   :  { %v1989_v26 = vpop.permute.xlu1 %771  ;;  %v1991_v27 = vpop.permute.xlu0 %766 }
  0x92   :  { %1084 = vperm.xlu2 %1468, %v1003_v63  }
  0x93   :  { %1081 = vperm.xlu1 %1467, %v1002_v39   ;;  %1078 = vperm.xlu0 %1466, %v1001_v32  }
  0x94   :  { %453 = vmatmul.bf16.gmra.mxu0 %v1268_v33  ;;  %493 = vmatmul.bf16.gmra.mxu2 %v1332_v22  ;;  %v2013_v35 = vpop.permute.xlu2 %836 }
  0x95   :  { %542 = vmatmul.bf16.gmra.mxu1 %v1272_v23  ;;  %582 = vmatmul.bf16.gmra.mxu3 %v1336_v34  ;;  %v2016_v3 = vpop.permute.xlu1 %786  ;;  %v2018_v36 = vpop.permute.xlu0 %781 }
  0x9a   :  { %1093 = vperm.xlu2 %1468, %v1006_v40  }
  0x9b   :  { %1090 = vperm.xlu1 %1467, %v1005_v41   ;;  %1087 = vperm.xlu0 %1466, %v1004_v50  }
  0x9c   :  { %v2025_v31 = vpop.permute.xlu2 %851 }
  0x9d   :  { %v802_v51 = vpop.permute.xlu1 %801  ;;  %v2028_v52 = vpop.permute.xlu0 %796 }
  0xa1   :  { %v419_v37 = vpop.f32.mrf.mxu0 }
  0xa2   :  { %v508_v38 = vpop.f32.mrf.mxu1  ;;  %1102 = vperm.xlu2 %1468, %v1009_v19  }
  0xa3   :  { %1099 = vperm.xlu1 %1467, %v1008_v20   ;;  %1096 = vperm.xlu0 %1466, %v1007_v46   ;;  %v509_v57 = vadd.f32 %v508_v38, %v419_v37 }
  0xa4   :  { %v2035_v47 = vpop.permute.xlu2 %866 }
  0xa5   :  { %v2037_v9 = vpop.permute.xlu1 %816  ;;  %v2039_v10 = vpop.permute.xlu0 %811  ;;  %v879_v30 = vmul.f32 %v1922_v49, %v509_v57 }
  0xa7   :  { %v459_v29 = vpop.f32.mrf.mxu2  ;;  %v915_v43 = vadd.f32 %v2047_v45, %v879_v30 }
  0xa8   :  { %v548_v59 = vpop.f32.mrf.mxu3 }
  0xa9   :  { %v549_v8 = vadd.f32 %v548_v59, %v459_v29  ;;  %v421_v17 = vpop.f32.mrf.mxu0 }
  0xaa   :  { %v510_v60 = vpop.f32.mrf.mxu1 }
  0xab   :  { %v2049_v61 = vmul.f32 %v802_v51, %v549_v8  ;;  %1105 = vperm.xlu0 %1466, %v1010_v44  }
  0xac   :  { %v1013_v5 = vpop.permute.xlu2 %1012 }
  0xad   :  { %v2052_v6 = vpop.permute.xlu1 %831  ;;  %v2054_v49 = vpop.permute.xlu0 %826  ;;  %vm1107_vm0 = vcmp.eq.s32.totalorder %v1013_v5, 1 }
  0xae   :  { %v1139_v0 = vsel %vm1107_vm0, %v915_v43, 0.0 }
  0xaf   :  { %1171 = vst [vmem:[%s2275_s4] sm:$0xff] %v1139_v0  ;;  %v461_v13 = vpop.f32.mrf.mxu2 }
  0xb0   :  { %v550_v14 = vpop.f32.mrf.mxu3 }
  0xb1   :  { %v551_v1 = vadd.f32 %v550_v14, %v461_v13  ;;  %v424_v4 = vpop.f32.mrf.mxu0 }
  0xb2   :  { %v513_v55 = vpop.f32.mrf.mxu1 }
  0xb3   :  { %v2060_v56 = vmul.f32 %v1965_v7, %v551_v1  ;;  %v514_v46 = vadd.f32 %v513_v55, %v424_v4 }
  0xb4   :  { %v1022_v21 = vpop.permute.xlu2 %1021 }
  0xb5   :  { %v2062_v15 = vpop.permute.xlu1 %846  ;;  %v2064_v16 = vpop.permute.xlu0 %841  ;;  %vm1110_vm1 = vcmp.eq.s32.totalorder %v1022_v21, 1  ;;  %v881_v59 = vmul.f32 %v1920_v48, %v514_v46 }
  0xb7   :  { %v464_v28 = vpop.f32.mrf.mxu2 }
  0xb8   :  { %v553_v62 = vpop.f32.mrf.mxu3 }
  0xb9   :  { %v426_v63 = vpop.f32.mrf.mxu0 }
  0xba   :  { %v515_v39 = vpop.f32.mrf.mxu1 }
  0xbb   :  { %v516_v32 = vadd.f32 %v515_v39, %v426_v63 }
  0xbc   :  { %v1031_v33 = vpop.permute.xlu2 %1030 }
  0xbd   :  { %v882_v22 = vmul.f32 %v1941_v54, %v516_v32  ;;  %v2067_v23 = vpop.permute.xlu1 %861  ;;  %v2069_v34 = vpop.permute.xlu0 %856  ;;  %v511_v54 = vadd.f32 %v510_v60, %v421_v17  ;;  %v917_v60 = vadd.f32 %v2047_v45, %v881_v59  ;;  %vm1113_vm6 = vcmp.eq.s32.totalorder %v1031_v33, 1 }
  0xbf   :  { %v918_v7 = vadd.f32 %v2047_v45, %v882_v22  ;;  %v2072_v40 = vpop.f32.mrf.mxu2  ;;  %v880_v30 = vmul.f32 %v1943_v2, %v511_v54  ;;  %v554_v22 = vadd.f32 %v553_v62, %v464_v28 }
  0xc0   :  { %v2074_v41 = vpop.f32.mrf.mxu3 }
  0xc1   :  { %v1142_v50 = vsel %vm1110_vm1, %v918_v7, 0.0  ;;  %v429_v51 = vpop.f32.mrf.mxu0  ;;  %v916_v14 = vadd.f32 %v2047_v45, %v880_v30  ;;  %v897_v28 = vmul.f32 %v2039_v10, %v554_v22 }
  0xc2   :  { %1174 = vst [vmem:[%s2275_s4 + $0x18] sm:$0xff] %v1142_v50  ;;  %v518_v19 = vpop.f32.mrf.mxu1 }
  0xc3   :  { %v519_v43 = vadd.f32 %v518_v19, %v429_v51 }
  0xc4   :  { %v2079_v20 = vpop.permute.xlu2 %1039 }
  0xc5   :  { %v2081_v37 = vpop.permute.xlu1 %876  ;;  %v2083_v38 = vpop.permute.xlu0 %871  ;;  %v883_v2 = vmul.f32 %v1844_v58, %v519_v43  ;;  %vm1116_vm12 = vcmp.eq.s32.totalorder %v2079_v20, 1 }
  0xc7   :  { %v2085_v57 = vpop.f32.mrf.mxu2  ;;  %v919_v58 = vadd.f32 %v2047_v45, %v883_v2 }
  0xc8   :  { %v2087_v29 = vpop.f32.mrf.mxu3 }
  0xc9   :  { %v431_v44 = vpop.f32.mrf.mxu0  ;;  %v559_v20 = vadd.f32 %v2087_v29, %v2085_v57 }
  0xca   :  { %v520_v8 = vpop.f32.mrf.mxu1 }
  0xcb   :  { %v521_v0 = vadd.f32 %v520_v8, %v431_v44 }
  0xcc   :  { %v2091_v5 = vpop.permute.xlu2 %1048 }
  0xcd   :  { %v1019_v17 = vpop.permute.xlu1 %1018  ;;  %v1016_v13 = vpop.permute.xlu0 %1015  ;;  %v884_v21 = vmul.f32 %v1877_v18, %v521_v0  ;;  %v933_v0 = vadd.f32 %v2047_v45, %v897_v28 }
  0xce   :  { %vm1109_vm2 = vcmp.eq.s32.totalorder %v1019_v17, 1  ;;  %vm1108_vm3 = vcmp.eq.s32.totalorder %v1016_v13, 1 }
  0xcf   :  { %v1141_v1 = vsel %vm1109_vm2, %v917_v60, 0.0  ;;  %v1140_v4 = vsel %vm1108_vm3, %v916_v14, 0.0  ;;  %v471_v55 = vpop.f32.mrf.mxu2  ;;  %v920_v19 = vadd.f32 %v2047_v45, %v884_v21 }
  0xd0   :  { %1173 = vst [vmem:[%s2275_s4 + $0x10] sm:$0xff] %v1141_v1  ;;  %v560_v48 = vpop.f32.mrf.mxu3 }
  0xd1   :  { %1172 = vst [vmem:[%s2275_s4 + $0x8] sm:$0xff] %v1140_v4  ;;  %v434_v63 = vpop.f32.mrf.mxu0  ;;  %v561_v10 = vadd.f32 %v560_v48, %v471_v55 }
  0xd2   :  { %v523_v39 = vpop.f32.mrf.mxu1 }
  0xd3   :  { %v524_v32 = vadd.f32 %v523_v39, %v434_v63  ;;  %v900_v55 = vmul.f32 %v2054_v49, %v561_v10 }
  0xd4   :  { %v2103_v7 = vpop.permute.xlu2 %1057 }
  0xd5   :  { %v885_v50 = vmul.f32 %v1970_v12, %v524_v32  ;;  %v1028_v51 = vpop.permute.xlu1 %1027  ;;  %v1025_v54 = vpop.permute.xlu0 %1024  ;;  %v936_v32 = vadd.f32 %v2047_v45, %v900_v55  ;;  %v931_v55 = vadd.f32 %v2047_v45, %v2049_v61 }
  0xd6   :  { %vm1112_vm4 = vcmp.eq.s32.totalorder %v1028_v51, 1  ;;  %vm1111_vm5 = vcmp.eq.s32.totalorder %v1025_v54, 1 }
  0xd7   :  { %v921_v18 = vadd.f32 %v2047_v45, %v885_v50  ;;  %v1144_v46 = vsel %vm1112_vm4, %v920_v19, 0.0  ;;  %v1143_v30 = vsel %vm1111_vm5, %v919_v58, 0.0  ;;  %v2109_v59 = vpop.f32.mrf.mxu2 }
  0xd8   :  { %1176 = vst [vmem:[%s2275_s4 + $0x28] sm:$0xff] %v1144_v46  ;;  %v2115_v12 = vpop.f32.mrf.mxu3 }
  0xd9   :  { %v1145_v62 = vsel %vm1113_vm6, %v921_v18, 0.0  ;;  %1175 = vst [vmem:[%s2275_s4 + $0x20] sm:$0xff] %v1143_v30  ;;  %v436_v44 = vpop.f32.mrf.mxu0  ;;  %vm1119_vm6 = vcmp.eq.s32.totalorder %v2091_v5, 1 }
  0xda   :  { %1177 = vst [vmem:[%s2275_s4 + $0x30] sm:$0xff] %v1145_v62  ;;  %v525_v8 = vpop.f32.mrf.mxu1 }
  0xdb   :  { %v526_v43 = vadd.f32 %v525_v8, %v436_v44 }
  0xdc   :  { %v1067_v33 = vpop.permute.xlu2 %1066 }
  0xdd   :  { %v886_v17 = vmul.f32 %v1968_v11, %v526_v43  ;;  %v1037_v60 = vpop.permute.xlu1 %1036  ;;  %v1034_v13 = vpop.permute.xlu0 %1033  ;;  %vm1125_vm7 = vcmp.eq.s32.totalorder %v1067_v33, 1 }
  0xde   :  { %vm1114_vm8 = vcmp.eq.s32.totalorder %v1034_v13, 1  ;;  %v1157_v14 = vsel %vm1125_vm7, %v933_v0, 0.0  ;;  %vm1115_vm10 = vcmp.eq.s32.totalorder %v1037_v60, 1 }
  0xdf   :  { %v922_v1 = vadd.f32 %v2047_v45, %v886_v17  ;;  %1189 = vst [vmem:[%s2275_s4 + $0x90] sm:$0xff] %v1157_v14  ;;  %v2129_v4 = vpop.f32.mrf.mxu2 }
  0xe0   :  { %v2132_v48 = vpop.f32.mrf.mxu3 }
  0xe1   :  { %v1146_v2 = vsel %vm1114_vm8, %v922_v1, 0.0  ;;  %v439_v21 = vpop.f32.mrf.mxu0 }
  0xe2   :  { %1178 = vst [vmem:[%s2275_s4 + $0x38] sm:$0xff] %v1146_v2  ;;  %v528_v11 = vpop.f32.mrf.mxu1  ;;  %v556_v2 = vadd.f32 %v2074_v41, %v2072_v40  ;;  %v899_v41 = vmul.f32 %v1980_v25, %v559_v20 }
  0xe3   :  { %v529_v63 = vadd.f32 %v528_v11, %v439_v21 }
  0xe4   :  { %v1076_v39 = vpop.permute.xlu2 %1075  ;;  %v935_v25 = vadd.f32 %v2047_v45, %v899_v41 }
  0xe5   :  { %v887_v22 = vmul.f32 %v1888_v24, %v529_v63  ;;  %v2139_v50 = vpop.permute.xlu1 %1045  ;;  %v1043_v51 = vpop.permute.xlu0 %1042  ;;  %vm1128_vm9 = vcmp.eq.s32.totalorder %v1076_v39, 1  ;;  %v932_v63 = vadd.f32 %v2047_v45, %v2060_v56 }
  0xe6   :  { %v1160_v49 = vsel %vm1128_vm9, %v936_v32, 0.0  ;;  %vm1117_vm15 = vcmp.eq.s32.totalorder %v1043_v51, 1  ;;  %vm1118_vm2 = vcmp.eq.s32.totalorder %v2139_v50, 1 }
  0xe7   :  { %v923_v19 = vadd.f32 %v2047_v45, %v887_v22  ;;  %1192 = vst [vmem:[%s2275_s4 + $0xa8] sm:$0xff] %v1160_v49  ;;  %v479_v54 = vpop.f32.mrf.mxu2 }
  0xe8   :  { %v568_v58 = vpop.f32.mrf.mxu3 }
  0xe9   :  { %v1147_v18 = vsel %vm1115_vm10, %v923_v19, 0.0  ;;  %v569_v46 = vadd.f32 %v568_v58, %v479_v54  ;;  %v441_v30 = vpop.f32.mrf.mxu0  ;;  %v566_v19 = vadd.f32 %v2132_v48, %v2129_v4 }
  0xea   :  { %1179 = vst [vmem:[%s2275_s4 + $0x40] sm:$0xff] %v1147_v18  ;;  %v530_v24 = vpop.f32.mrf.mxu1 }
  0xeb   :  { %v903_v28 = vmul.f32 %v2064_v16, %v569_v46  ;;  %v531_v62 = vadd.f32 %v530_v24, %v441_v30  ;;  %v564_v46 = vadd.f32 %v2115_v12, %v2109_v59  ;;  %v902_v4 = vmul.f32 %v2013_v35, %v566_v19 }
  0xec   :  { %v1085_v44 = vpop.permute.xlu2 %1084 }
  0xed   :  { %v888_v8 = vmul.f32 %v1991_v27, %v531_v62  ;;  %v2150_v43 = vpop.permute.xlu1 %1054  ;;  %v2152_v10 = vpop.permute.xlu0 %1051  ;;  %v939_v33 = vadd.f32 %v2047_v45, %v903_v28  ;;  %vm1131_vm11 = vcmp.eq.s32.totalorder %v1085_v44, 1  ;;  %v901_v44 = vmul.f32 %v2052_v6, %v564_v46 }
  0xee   :  { %vm1120_vm9 = vcmp.eq.s32.totalorder %v2152_v10, 1 }
  0xef   :  { %v924_v0 = vadd.f32 %v2047_v45, %v888_v8  ;;  %v1163_v17 = vsel %vm1131_vm11, %v939_v33, 0.0  ;;  %v481_v60 = vpop.f32.mrf.mxu2  ;;  %v937_v6 = vadd.f32 %v2047_v45, %v901_v44 }
  0xf0   :  { %1195 = vst [vmem:[%s2275_s4 + $0xc0] sm:$0xff] %v1163_v17  ;;  %v570_v16 = vpop.f32.mrf.mxu3 }
  0xf1   :  { %v1148_v13 = vsel %vm1116_vm12, %v924_v0, 0.0  ;;  %v444_v27 = vpop.f32.mrf.mxu0  ;;  %v938_v0 = vadd.f32 %v2047_v45, %v902_v4  ;;  %v571_v17 = vadd.f32 %v570_v16, %v481_v60  ;;  %vm1121_vm12 = vcmp.eq.s32.totalorder %v2150_v43, 1 }
  0xf2   :  { %1180 = vst [vmem:[%s2275_s4 + $0x48] sm:$0xff] %v1148_v13  ;;  %v533_v14 = vpop.f32.mrf.mxu1 }
  0xf3   :  { %v534_v1 = vadd.f32 %v533_v14, %v444_v27  ;;  %v904_v16 = vmul.f32 %v2062_v15, %v571_v17 }
  0xf4   :  { %v1094_v50 = vpop.permute.xlu2 %1093 }
  0xf5   :  { %v889_v21 = vmul.f32 %v1989_v26, %v534_v1  ;;  %v1064_v11 = vpop.permute.xlu1 %1063  ;;  %v1061_v39 = vpop.permute.xlu0 %1060  ;;  %v898_v26 = vmul.f32 %v2037_v9, %v556_v2  ;;  %vm1134_vm3 = vcmp.eq.s32.totalorder %v1094_v50, 1 }
  0xf6   :  { %vm1124_vm13 = vcmp.eq.s32.totalorder %v1064_v11, 1  ;;  %vm1123_vm14 = vcmp.eq.s32.totalorder %v1061_v39, 1 }
  0xf7   :  { %v925_v32 = vadd.f32 %v2047_v45, %v889_v21  ;;  %v1156_v22 = vsel %vm1124_vm13, %v932_v63, 0.0  ;;  %v1155_v49 = vsel %vm1123_vm14, %v931_v55, 0.0  ;;  %v484_v61 = vpop.f32.mrf.mxu2  ;;  %v934_v18 = vadd.f32 %v2047_v45, %v898_v26 }
  0xf8   :  { %1188 = vst [vmem:[%s2275_s4 + $0x88] sm:$0xff] %v1156_v22  ;;  %v573_v40 = vpop.f32.mrf.mxu3  ;;  %vm1122_vm14 = vcmp.eq.s32.totalorder %v2103_v7, 1 }
  0xf9   :  { %v1149_v57 = vsel %vm1117_vm15, %v925_v32, 0.0  ;;  %1187 = vst [vmem:[%s2275_s4 + $0x80] sm:$0xff] %v1155_v49  ;;  %v446_v56 = vpop.f32.mrf.mxu0  ;;  %v574_v13 = vadd.f32 %v573_v40, %v484_v61  ;;  %v940_v40 = vadd.f32 %v2047_v45, %v904_v16 }
  0xfa   :  { %1181 = vst [vmem:[%s2275_s4 + $0x50] sm:$0xff] %v1149_v57  ;;  %v535_v29 = vpop.f32.mrf.mxu1 }
  0xfb   :  { %v536_v51 = vadd.f32 %v535_v29, %v446_v56  ;;  %v905_v11 = vmul.f32 %v2025_v31, %v574_v13 }
  0xfd   :  { %v890_v54 = vmul.f32 %v1917_v42, %v536_v51  ;;  %v1073_v9 = vpop.permute.xlu1 %1072  ;;  %v1070_v58 = vpop.permute.xlu0 %1069  ;;  %v941_v49 = vadd.f32 %v2047_v45, %v905_v11 }
  0xfe   :  { %vm1127_vm0 = vcmp.eq.s32.totalorder %v1073_v9, 1  ;;  %vm1126_vm1 = vcmp.eq.s32.totalorder %v1070_v58, 1 }
  0xff   :  { %v926_v30 = vadd.f32 %v2047_v45, %v890_v54  ;;  %v1159_v24 = vsel %vm1127_vm0, %v935_v25, 0.0  ;;  %v1158_v28 = vsel %vm1126_vm1, %v934_v18, 0.0  ;;  %v486_v62 = vpop.f32.mrf.mxu2 }
 0x100   :  { %1191 = vst [vmem:[%s2275_s4 + $0xa0] sm:$0xff] %v1159_v24  ;;  %v575_v42 = vpop.f32.mrf.mxu3 }
 0x101   :  { %v1150_v48 = vsel %vm1118_vm2, %v926_v30, 0.0  ;;  %1190 = vst [vmem:[%s2275_s4 + $0x98] sm:$0xff] %v1158_v28  ;;  %v576_v59 = vadd.f32 %v575_v42, %v486_v62  ;;  %v449_v12 = vpop.f32.mrf.mxu0 }
 0x102   :  { %1182 = vst [vmem:[%s2275_s4 + $0x58] sm:$0xff] %v1150_v48  ;;  %v538_v35 = vpop.f32.mrf.mxu1 }
 0x103   :  { %v906_v8 = vmul.f32 %v2069_v34, %v576_v59  ;;  %v539_v33 = vadd.f32 %v538_v35, %v449_v12  ;;  %v1103_v12 = vpop.permute.xlu2 %1102 }
 0x104   :  { %vm1137_vm13 = vcmp.eq.s32.totalorder %v1103_v12, 1 }
 0x105   :  { %v942_v27 = vadd.f32 %v2047_v45, %v906_v8  ;;  %v891_v14 = vmul.f32 %v2018_v36, %v539_v33  ;;  %v1082_v1 = vpop.permute.xlu1 %1081  ;;  %v1079_v55 = vpop.permute.xlu0 %1078 }
 0x106   :  { %vm1130_vm4 = vcmp.eq.s32.totalorder %v1082_v1, 1  ;;  %vm1129_vm5 = vcmp.eq.s32.totalorder %v1079_v55, 1 }
 0x107   :  { %v1166_v2 = vsel %vm1134_vm3, %v942_v27, 0.0  ;;  %v927_v20 = vadd.f32 %v2047_v45, %v891_v14  ;;  %v1162_v34 = vsel %vm1130_vm4, %v938_v0, 0.0  ;;  %v489_v21 = vpop.f32.mrf.mxu2  ;;  %v1161_v60 = vsel %vm1129_vm5, %v937_v6, 0.0 }
 0x108   :  { %1198 = vst [vmem:[%s2275_s4 + $0xd8] sm:$0xff] %v1166_v2  ;;  %v578_v36 = vpop.f32.mrf.mxu3 }
 0x109   :  { %v1151_v63 = vsel %vm1119_vm6, %v927_v20, 0.0  ;;  %1194 = vst [vmem:[%s2275_s4 + $0xb8] sm:$0xff] %v1162_v34  ;;  %v451_v39 = vpop.f32.mrf.mxu0  ;;  %v579_v22 = vadd.f32 %v578_v36, %v489_v21 }
 0x10a   :  { %1183 = vst [vmem:[%s2275_s4 + $0x60] sm:$0xff] %v1151_v63  ;;  %v540_v5 = vpop.f32.mrf.mxu1 }
 0x10b   :  { %1193 = vst [vmem:[%s2275_s4 + $0xb0] sm:$0xff] %v1161_v60  ;;  %v541_v32 = vadd.f32 %v540_v5, %v451_v39  ;;  %v907_v29 = vmul.f32 %v2067_v23, %v579_v22 }
 0x10d   :  { %v892_v15 = vmul.f32 %v2016_v3, %v541_v32  ;;  %v1091_v31 = vpop.permute.xlu1 %1090  ;;  %v1088_v61 = vpop.permute.xlu0 %1087  ;;  %v943_v30 = vadd.f32 %v2047_v45, %v907_v29 }
 0x10e   :  { %vm1133_vm7 = vcmp.eq.s32.totalorder %v1091_v31, 1  ;;  %vm1132_vm8 = vcmp.eq.s32.totalorder %v1088_v61, 1 }
 0x10f   :  { %v928_v26 = vadd.f32 %v2047_v45, %v892_v15  ;;  %v1165_v41 = vsel %vm1133_vm7, %v941_v49, 0.0  ;;  %v1164_v57 = vsel %vm1132_vm8, %v940_v40, 0.0  ;;  %v491_v56 = vpop.f32.mrf.mxu2 }
 0x110   :  { %1197 = vst [vmem:[%s2275_s4 + $0xd0] sm:$0xff] %v1165_v41  ;;  %v580_v3 = vpop.f32.mrf.mxu3 }
 0x111   :  { %v1152_v51 = vsel %vm1120_vm9, %v928_v26, 0.0  ;;  %1196 = vst [vmem:[%s2275_s4 + $0xc8] sm:$0xff] %v1164_v57  ;;  %v581_v19 = vadd.f32 %v580_v3, %v491_v56  ;;  %v454_v54 = vpop.f32.mrf.mxu0 }
 0x112   :  { %1184 = vst [vmem:[%s2275_s4 + $0x68] sm:$0xff] %v1152_v51  ;;  %v543_v9 = vpop.f32.mrf.mxu1 }
 0x113   :  { %v908_v10 = vmul.f32 %v2035_v47, %v581_v19  ;;  %v544_v25 = vadd.f32 %v543_v9, %v454_v54 }
 0x115   :  { %v893_v58 = vmul.f32 %v1932_v53, %v544_v25  ;;  %v1100_v18 = vpop.permute.xlu1 %1099  ;;  %v944_v23 = vadd.f32 %v2047_v45, %v908_v10  ;;  %v1097_v46 = vpop.permute.xlu0 %1096 }
 0x116   :  { %vm1136_vm10 = vcmp.eq.s32.totalorder %v1100_v18, 1  ;;  %vm1135_vm11 = vcmp.eq.s32.totalorder %v1097_v46, 1 }
 0x117   :  { %v929_v24 = vadd.f32 %v2047_v45, %v893_v58  ;;  %v1168_v28 = vsel %vm1136_vm10, %v944_v23, 0.0  ;;  %v1167_v62 = vsel %vm1135_vm11, %v943_v30, 0.0  ;;  %v494_v4 = vpop.f32.mrf.mxu2 }
 0x118   :  { %1200 = vst [vmem:[%s2275_s4 + $0xe8] sm:$0xff] %v1168_v28  ;;  %v583_v53 = vpop.f32.mrf.mxu3 }
 0x119   :  { %v1153_v47 = vsel %vm1121_vm12, %v929_v24, 0.0  ;;  %1199 = vst [vmem:[%s2275_s4 + $0xe0] sm:$0xff] %v1167_v62  ;;  %v584_v42 = vadd.f32 %v583_v53, %v494_v4  ;;  %v456_v48 = vpop.f32.mrf.mxu0 }
 0x11a   :  { %1185 = vst [vmem:[%s2275_s4 + $0x70] sm:$0xff] %v1153_v47  ;;  %v545_v59 = vpop.f32.mrf.mxu1 }
 0x11b   :  { %v909_v43 = vmul.f32 %v2083_v38, %v584_v42  ;;  %v546_v44 = vadd.f32 %v545_v59, %v456_v48 }
 0x11d   :  { %v945_v35 = vadd.f32 %v2047_v45, %v909_v43  ;;  %v894_v50 = vmul.f32 %v2028_v52, %v546_v44  ;;  %v1106_v38 = vpop.permute.xlu0 %1105 }
 0x11e   :  { %vm1138_vm15 = vcmp.eq.s32.totalorder %v1106_v38, 1 }
 0x11f   :  { %v1169_v8 = vsel %vm1137_vm13, %v945_v35, 0.0  ;;  %v930_v33 = vadd.f32 %v2047_v45, %v894_v50  ;;  %v496_v0 = vpop.f32.mrf.mxu2 }
 0x120   :  { %1201 = vst [vmem:[%s2275_s4 + $0xf0] sm:$0xff] %v1169_v8  ;;  %v585_v17 = vpop.f32.mrf.mxu3 }
 0x121   :  { %v1154_v13 = vsel %vm1122_vm14, %v930_v33, 0.0  ;;  %v586_v27 = vadd.f32 %v585_v17, %v496_v0 }
 0x122   :  { %1186 = vst [vmem:[%s2275_s4 + $0x78] sm:$0xff] %v1154_v13 }
 0x123   :  { %v910_v52 = vmul.f32 %v2081_v37, %v586_v27 }
 0x125   :  { %v946_v14 = vadd.f32 %v2047_v45, %v910_v52 }
 0x127   :  { %v1170_v1 = vsel %vm1138_vm15, %v946_v14, 0.0 }
 0x128   :  { %1202 = vst [vmem:[%s2275_s4 + $0xf8] sm:$0xff] %v1170_v1 }

</bundles_post_ra>
